<compile_context>
chip_gen: v7x
topology: tpu7x:2x2x1
jax: 0.10.0
libtpu: 0.0.40
codegen_flags: <defaults>
</compile_context>

<pallas_src>
import functools
import math

import jax
import jax.numpy as jnp
from jax.experimental import pallas as pl
from jax.experimental.pallas import tpu as pltpu


def _rwkv_kernel(
    x_ref,                      # (Bt, D, D)   input activations
    g1_ref, b1_ref,             # (D, D)  ln1 weight/bias (compute dtype)
    g2_ref, b2_ref,             # (D, D)  ln2 weight/bias (compute dtype)
    wkvr_ref, bkvr_ref,         # (D, 3D) compute dtype, (1, 3D) f32
    w1_ref, bf1_ref,            # (D, 4D) compute dtype, (1, 4D) f32
    w2_ref, bf2_ref,            # (4D, D) compute dtype, (1, D)  f32
    o_ref,                      # (Bt, D, D)
    acc_ref,                    # (Bt*D, D) f32 scratch: x1, then x1 + ffn
    *, kvr_chunk, ffn_chunk, approx_gelu,
):
    Bt, D, _ = x_ref.shape
    n = D * D
    M = Bt * D
    eps = 1e-5
    f32 = jnp.float32
    cdt = wkvr_ref.dtype        # matmul operand dtype (bf16 by default)

    def _sum2(z):               # reduce last two axes, keepdims
        return jnp.sum(jnp.sum(z, axis=2, keepdims=True), axis=1, keepdims=True)

    def layernorm(z, g_ref, b_ref):
        # Two-pass statistics in f32 over the D*D features of each batch
        # element (matches nn.LayerNorm numerics; the extra XLU reduction has
        # slack relative to the MXU/VPU work).
        mean = _sum2(z) * (1.0 / n)
        zc = z - mean
        var = _sum2(zc * zc) * (1.0 / n)
        inv = jax.lax.rsqrt(var + eps)
        g = g_ref[...].astype(f32)
        b = b_ref[...].astype(f32)
        return zc * inv * g[None] + b[None]

    def gelu(h):
        if approx_gelu:
            # tanh approximation routes to the EUP slot instead of an erf
            # polynomial on the VALU (use when the VPU is the bottleneck).
            c = math.sqrt(2.0 / math.pi)
            return 0.5 * h * (1.0 + jnp.tanh(c * (h + 0.044715 * h * h * h)))
        # exact (erf) GELU, matching torch.nn.GELU() default
        return 0.5 * h * (1.0 + jax.lax.erf(h * (1.0 / math.sqrt(2.0))))

    # ---- time-mixing branch -------------------------------------------------
    xb = x_ref[...].astype(f32)                               # (Bt, D, D)
    xn = layernorm(xb, g1_ref, b1_ref)
    xn2d = xn.reshape(M, D).astype(cdt)                       # merge leading dims

    acc_ref[...] = xb.reshape(M, D)                           # x1 accumulator
    if kvr_chunk >= D:
        # one wide MXU matmul for k|v|r (time-mix scales folded into wkvr)
        kvr = jnp.dot(xn2d, wkvr_ref[...],
                      preferred_element_type=f32) + bkvr_ref[...]
        k = kvr[:, :D]
        v = kvr[:, D:2 * D]
        r = jax.nn.sigmoid(kvr[:, 2 * D:])
        acc_ref[...] += r * k * v
    else:
        # column-slab processing: the (M, 3D) f32 kvr never fully materializes
        c0 = 0
        while c0 < D:                                         # static, unrolled
            c1 = min(c0 + kvr_chunk, D)
            k = jnp.dot(xn2d, wkvr_ref[:, c0:c1],
                        preferred_element_type=f32) + bkvr_ref[:, c0:c1]
            v = jnp.dot(xn2d, wkvr_ref[:, D + c0:D + c1],
                        preferred_element_type=f32) + bkvr_ref[:, D + c0:D + c1]
            r = jax.nn.sigmoid(
                jnp.dot(xn2d, wkvr_ref[:, 2 * D + c0:2 * D + c1],
                        preferred_element_type=f32)
                + bkvr_ref[:, 2 * D + c0:2 * D + c1])
            acc_ref[:, c0:c1] += r * k * v
            c0 = c1

    # ---- FFN branch -----------------------------------------------------------
    xn2 = layernorm(acc_ref[...].reshape(Bt, D, D), g2_ref, b2_ref)
    xn2d = xn2.reshape(M, D).astype(cdt)

    H = w1_ref.shape[1]
    acc_ref[...] += jnp.broadcast_to(bf2_ref[...], (M, D))
    c0 = 0
    while c0 < H:                                             # static, unrolled
        c1 = min(c0 + ffn_chunk, H)
        h = jnp.dot(xn2d, w1_ref[:, c0:c1],
                    preferred_element_type=f32) + bf1_ref[:, c0:c1]
        h = gelu(h)
        acc_ref[...] += jnp.dot(h.astype(cdt), w2_ref[c0:c1, :],
                                preferred_element_type=f32)
        c0 = c1

    o_ref[...] = acc_ref[...].reshape(Bt, D, D).astype(o_ref.dtype)


def _vmem_capacity_bytes():
    try:
        return int(pltpu.get_tpu_info().vmem_capacity_bytes)
    except Exception:
        return 128 * 1024 * 1024            # v5e/v6e physical VMEM


def _pick_block_b(B, D, x_itemsize, vmem_cap):
    """Largest batch block within a per-generation VMEM activation budget.

    Small-VMEM parts (v7x: 64 MiB/TC, 2 TensorCores) prefer an even number of
    grid steps so the 'parallel' axis splits evenly across the cores; 128 MiB
    single-TC parts (v5e/v6e) may use a single big step for better MXU fill.
    """
    small_vmem = vmem_cap < 100 * 1024 * 1024
    act_budget = (4 if small_vmem else 8) * 1024 * 1024
    per_b = D * D * (4 * x_itemsize + 4 + 5 * 4)   # pipelined io + scratch + f32 temps
    cap = max(1, act_budget // per_b)
    divisors = [bb for bb in range(1, B + 1) if B % bb == 0 and bb <= cap]
    if not divisors:
        divisors = [1]
    if small_vmem:
        even = [bb for bb in divisors if (B // bb) >= 2 and (B // bb) % 2 == 0]
        if even:
            return max(even)
        two = [bb for bb in divisors if (B // bb) >= 2]
        if two:
            return max(two)
    return max(divisors)


def _build_call(x, consts, block_b, kvr_chunk, ffn_chunk, approx_gelu,
                single_buffer_consts, vmem_cap):
    B, D, _ = x.shape

    # TODO(synk): for very large d_model (D >= ~1536 on v7x) stream w1/w2 from
    # HBM (memory_space=pl.ANY + pltpu.emit_pipeline) instead of keeping the
    # full 4D x D pair resident.
    if single_buffer_consts:
        # Constants return the same block every grid step; single-buffer them.
        const_specs = [pl.BlockSpec(c.shape, lambda i: (0, 0),
                                    pipeline_mode=pl.Buffered(1)) for c in consts]
        w_mult = 1
    else:
        const_specs = [pl.BlockSpec(c.shape, lambda i: (0, 0)) for c in consts]
        w_mult = 2

    grid_spec = pltpu.PrefetchScalarGridSpec(
        num_scalar_prefetch=0,
        grid=(B // block_b,),
        in_specs=[pl.BlockSpec((block_b, D, D), lambda i: (i, 0, 0))] + const_specs,
        out_specs=pl.BlockSpec((block_b, D, D), lambda i: (i, 0, 0)),
        scratch_shapes=[pltpu.VMEM((block_b * D, D), jnp.float32)],
    )

    # ---- VMEM footprint estimate: weights + pipelined io + scratch + temps --
    w_bytes = sum(int(c.size) * c.dtype.itemsize for c in consts)
    io_bytes = 2 * 2 * block_b * D * D * x.dtype.itemsize    # x + out, dbl-buffered
    scratch_bytes = block_b * D * D * 4
    temp_bytes = (5 * block_b * D * D * 4                    # xb/xn/xn2 + casts
                  + 6 * block_b * D * max(3 * kvr_chunk, ffn_chunk))
    vmem_est = w_mult * w_bytes + io_bytes + scratch_bytes + temp_bytes

    cp_kwargs = dict(dimension_semantics=("parallel",))
    # v5e's default scoped VMEM is 16 MiB -> raise the limit early; cap at
    # ~85% of physical VMEM (v7x has only 64 MiB per TensorCore).
    if vmem_est > 12 * 1024 * 1024:
        cp_kwargs["vmem_limit_bytes"] = int(
            min(max(2 * vmem_est, 32 * 1024 * 1024), int(0.85 * vmem_cap)))

    flops = 2 * B * D * D * (3 * D + 2 * 4 * D)              # kvr + 2 FFN matmuls
    transcendentals = B * D * D * 5                          # GELU + sigmoid
    bytes_accessed = int(w_bytes + 2 * x.size * x.dtype.itemsize)

    return pl.pallas_call(
        functools.partial(_rwkv_kernel, kvr_chunk=kvr_chunk, ffn_chunk=ffn_chunk,
                          approx_gelu=approx_gelu),
        out_shape=jax.ShapeDtypeStruct((B, D, D), x.dtype),
        grid_spec=grid_spec,
        compiler_params=pltpu.CompilerParams(**cp_kwargs),
        cost_estimate=pl.CostEstimate(
            flops=int(flops),
            transcendentals=int(transcendentals),
            bytes_accessed=bytes_accessed),
    )


def rwkv_block_pallas(x, params, *, compute_dtype=jnp.bfloat16, block_b=None,
                      kvr_chunk=None, ffn_chunk=None, approx_gelu=False):
    """Forward pass of RWKVBlock.  x: (B, d_model, d_model)."""
    B, D, D2 = x.shape
    assert D == D2
    H = 4 * D
    f32 = jnp.float32
    vmem_cap = _vmem_capacity_bytes()

    if block_b is None:
        block_b = _pick_block_b(B, D, x.dtype.itemsize, vmem_cap)
    assert B % block_b == 0
    if ffn_chunk is None:
        ffn_chunk = min(H, 1024)             # keep the GELU slab modest (v7x VMEM)
    ffn_chunk = min(ffn_chunk, H)
    if kvr_chunk is None:
        kvr_chunk = D if D <= 512 else 512   # avoid full (M, 3D) f32 kvr at large D
    kvr_chunk = min(kvr_chunk, D)

    # ---- host-side parameter prep (constant folding, done once) -------------
    # LayerNorm gamma/beta in the compute dtype (the largest constants);
    # statistics and normalization stay f32 inside the kernel.
    g1 = params["ln1_w"].reshape(D, D).astype(compute_dtype)
    b1 = params["ln1_b"].reshape(D, D).astype(compute_dtype)
    g2 = params["ln2_w"].reshape(D, D).astype(compute_dtype)
    b2 = params["ln2_b"].reshape(D, D).astype(compute_dtype)

    tmk = params["time_mix_k"].reshape(D)
    tmv = params["time_mix_v"].reshape(D)
    tmr = params["time_mix_r"].reshape(D)
    tmf = params["ffn_time_mix"].reshape(D)

    # Fold time-mix scales into the pre-transposed weights; fuse k|v|r.
    wk = tmk[:, None] * params["key_w"].T                     # (D, D)
    wv = tmv[:, None] * params["value_w"].T
    wr = tmr[:, None] * params["recept_w"].T
    wkvr = jnp.concatenate([wk, wv, wr], axis=1).astype(compute_dtype)   # (D, 3D)
    bkvr = jnp.concatenate(
        [params["key_b"], params["value_b"], params["recept_b"]]
    ).reshape(1, 3 * D).astype(f32)

    w1 = (tmf[:, None] * params["ffn1_w"].T).astype(compute_dtype)       # (D, 4D)
    bf1 = params["ffn1_b"].reshape(1, H).astype(f32)
    w2 = params["ffn2_w"].T.astype(compute_dtype)                        # (4D, D)
    bf2 = params["ffn2_b"].reshape(1, D).astype(f32)

    consts = (g1, b1, g2, b2, wkvr, bkvr, w1, bf1, w2, bf2)

    try:
        fn = _build_call(x, consts, block_b, kvr_chunk, ffn_chunk, approx_gelu,
                         single_buffer_consts=True, vmem_cap=vmem_cap)
        return fn(x, *consts)
    except Exception:
        # TODO(synk): drop this fallback once pl.Buffered(1) (single-buffered
        # constants) is confirmed supported on every target JAX version.
        fn = _build_call(x, consts, block_b, kvr_chunk, ffn_chunk, approx_gelu,
                         single_buffer_consts=False, vmem_cap=vmem_cap)
        return fn(x, *consts)


def rwkv_block_ref(x, params):
    """Pure-JAX reference matching the PyTorch forward."""
    B, D, _ = x.shape
    eps = 1e-5

    def ln(z_flat, w, b):
        mean = jnp.mean(z_flat, axis=-1, keepdims=True)
        var = jnp.mean((z_flat - mean) ** 2, axis=-1, keepdims=True)
        return (z_flat - mean) / jnp.sqrt(var + eps) * w + b

    xf = x.reshape(B, -1)
    xn = ln(xf, params["ln1_w"], params["ln1_b"]).reshape(B, D, D)

    lin = lambda z, w, bb: jnp.einsum("bhd,od->bho", z, w) + bb
    k = lin(xn * params["time_mix_k"], params["key_w"], params["key_b"])
    v = lin(xn * params["time_mix_v"], params["value_w"], params["value_b"])
    r = jax.nn.sigmoid(
        lin(xn * params["time_mix_r"], params["recept_w"], params["recept_b"]))
    x1 = x + r * (k * v)

    xn2 = ln(x1.reshape(B, -1), params["ln2_w"], params["ln2_b"]).reshape(B, D, D)
    h = lin(xn2 * params["ffn_time_mix"], params["ffn1_w"], params["ffn1_b"])
    h = 0.5 * h * (1.0 + jax.lax.erf(h / math.sqrt(2.0)))
    ff = jnp.einsum("bhd,od->bho", h, params["ffn2_w"]) + params["ffn2_b"]
    return x1 + ff


def init_params(key, d_model):
    D = d_model
    keys = jax.random.split(key, 16)

    def linear_init(k, d_in, d_out):
        bound = 1.0 / math.sqrt(d_in)
        kw, kb = jax.random.split(k)
        w = jax.random.uniform(kw, (d_out, d_in), jnp.float32, -bound, bound)
        b = jax.random.uniform(kb, (d_out,), jnp.float32, -bound, bound)
        return w, b

    kw_, kb_ = linear_init(keys[0], D, D)
    vw_, vb_ = linear_init(keys[1], D, D)
    rw_, rb_ = linear_init(keys[2], D, D)
    f1w, f1b = linear_init(keys[3], D, 4 * D)
    f2w, f2b = linear_init(keys[4], 4 * D, D)

    params = {
        "ln1_w": 1.0 + 0.1 * jax.random.normal(keys[5], (D * D,), jnp.float32),
        "ln1_b": 0.1 * jax.random.normal(keys[6], (D * D,), jnp.float32),
        "ln2_w": 1.0 + 0.1 * jax.random.normal(keys[7], (D * D,), jnp.float32),
        "ln2_b": 0.1 * jax.random.normal(keys[8], (D * D,), jnp.float32),
        "time_mix_k": jax.random.uniform(keys[9], (1, 1, D), jnp.float32),
        "time_mix_v": jax.random.uniform(keys[10], (1, 1, D), jnp.float32),
        "time_mix_r": jax.random.uniform(keys[11], (1, 1, D), jnp.float32),
        "ffn_time_mix": jax.random.uniform(keys[12], (1, 1, D), jnp.float32),
        "key_w": kw_, "key_b": kb_,
        "value_w": vw_, "value_b": vb_,
        "recept_w": rw_, "recept_b": rb_,
        "ffn1_w": f1w, "ffn1_b": f1b,
        "ffn2_w": f2w, "ffn2_b": f2b,
    }
    # NOTE: time_decay / time_first / `output` Linear exist in __init__ but are
    # unused in forward, so they are intentionally not materialized here.
    return params


if __name__ == "__main__":
    B, D = 2, 16  # x: [batch, d_model, d_model]
    key = jax.random.PRNGKey(0)
    kx, kp = jax.random.split(key)
    x = jax.random.normal(kx, (B, D, D), jnp.float32)
    params = init_params(kp, D)

    ref = rwkv_block_ref(x, params)

    # f32 compute path: tight check that the folded/fused math is exact.
    out_f32 = jax.block_until_ready(
        rwkv_block_pallas(x, params, compute_dtype=jnp.float32))
    assert out_f32.shape == (B, D, D)
    assert jnp.allclose(out_f32, ref, atol=1e-4, rtol=1e-4), (
        float(jnp.max(jnp.abs(out_f32 - ref))))

    # Chunked kvr / FFN code paths (f32, tight check).
    out_chunked = jax.block_until_ready(
        rwkv_block_pallas(x, params, compute_dtype=jnp.float32,
                          block_b=1, kvr_chunk=8, ffn_chunk=16))
    assert jnp.allclose(out_chunked, ref, atol=1e-4, rtol=1e-4), (
        float(jnp.max(jnp.abs(out_chunked - ref))))

    # bf16 matmul path (default performance config): looser tolerance.
    out_bf16 = jax.block_until_ready(rwkv_block_pallas(x, params))
    assert out_bf16.shape == (B, D, D)
    assert jnp.allclose(out_bf16, ref, atol=5e-2, rtol=5e-2), (
        float(jnp.max(jnp.abs(out_bf16 - ref))))

    print("KERNEL_OK")
</pallas_src>

<mosaic_0001>
module attributes {stable_mosaic.version = 11 : i64} {
  func.func @_rwkv_kernel(%arg0: i32, %arg1: memref<2x16x16xf32, #tpu.memory_space<vmem>>, %arg2: memref<16x16xf32, #tpu.memory_space<vmem>>, %arg3: memref<16x16xf32, #tpu.memory_space<vmem>>, %arg4: memref<16x16xf32, #tpu.memory_space<vmem>>, %arg5: memref<16x16xf32, #tpu.memory_space<vmem>>, %arg6: memref<16x48xf32, #tpu.memory_space<vmem>>, %arg7: memref<1x48xf32, #tpu.memory_space<vmem>>, %arg8: memref<16x64xf32, #tpu.memory_space<vmem>>, %arg9: memref<1x64xf32, #tpu.memory_space<vmem>>, %arg10: memref<64x16xf32, #tpu.memory_space<vmem>>, %arg11: memref<1x16xf32, #tpu.memory_space<vmem>>, %arg12: memref<2x16x16xf32, #tpu.memory_space<vmem>>, %arg13: memref<32x16xf32, #tpu.memory_space<vmem>>) attributes {dimension_semantics = [#tpu.dimension_semantics<parallel>], iteration_bounds = array<i64: 1>, scalar_prefetch = 0 : i64, scratch_operands = 1 : i64, tpu.core_type = #tpu.core_type<tc>, window_params = [{transform_indices = @transform_0, window_bounds = array<i64: 2, 16, 16>}, {pipeline_mode = #tpu.pipeline_mode<synchronous>, transform_indices = @transform_1, window_bounds = array<i64: 16, 16>}, {pipeline_mode = #tpu.pipeline_mode<synchronous>, transform_indices = @transform_2, window_bounds = array<i64: 16, 16>}, {pipeline_mode = #tpu.pipeline_mode<synchronous>, transform_indices = @transform_3, window_bounds = array<i64: 16, 16>}, {pipeline_mode = #tpu.pipeline_mode<synchronous>, transform_indices = @transform_4, window_bounds = array<i64: 16, 16>}, {pipeline_mode = #tpu.pipeline_mode<synchronous>, transform_indices = @transform_5, window_bounds = array<i64: 16, 48>}, {pipeline_mode = #tpu.pipeline_mode<synchronous>, transform_indices = @transform_6, window_bounds = array<i64: 1, 48>}, {pipeline_mode = #tpu.pipeline_mode<synchronous>, transform_indices = @transform_7, window_bounds = array<i64: 16, 64>}, {pipeline_mode = #tpu.pipeline_mode<synchronous>, transform_indices = @transform_8, window_bounds = array<i64: 1, 64>}, {pipeline_mode = #tpu.pipeline_mode<synchronous>, transform_indices = @transform_9, window_bounds = array<i64: 64, 16>}, {pipeline_mode = #tpu.pipeline_mode<synchronous>, transform_indices = @transform_10, window_bounds = array<i64: 1, 16>}, {transform_indices = @transform_11, window_bounds = array<i64: 2, 16, 16>}]} {
    %c0 = arith.constant 0 : index
    %c0_0 = arith.constant 0 : index
    %c0_1 = arith.constant 0 : index
    %0 = vector.load %arg1[%c0, %c0_0, %c0_1] : memref<2x16x16xf32, #tpu.memory_space<vmem>>, vector<2x16x16xf32>
    %cst = arith.constant dense<0.000000e+00> : vector<2x16xf32>
    %1 = vector.multi_reduction <add>, %0, %cst [2] : vector<2x16x16xf32> to vector<2x16xf32>
    %2 = vector.shape_cast %1 : vector<2x16xf32> to vector<2x16x1xf32>
    %cst_2 = arith.constant dense<0.000000e+00> : vector<2x1xf32>
    %3 = vector.multi_reduction <add>, %2, %cst_2 [1] : vector<2x16x1xf32> to vector<2x1xf32>
    %4 = vector.shape_cast %3 : vector<2x1xf32> to vector<2x1x1xf32>
    %cst_3 = arith.constant 3.906250e-03 : f32
    %5 = vector.broadcast %cst_3 : f32 to vector<2x1x1xf32>
    %6 = arith.mulf %4, %5 : vector<2x1x1xf32>
    %7 = vector.broadcast %6 : vector<2x1x1xf32> to vector<2x16x16xf32>
    %8 = arith.subf %0, %7 : vector<2x16x16xf32>
    %9 = arith.mulf %8, %8 : vector<2x16x16xf32>
    %cst_4 = arith.constant dense<0.000000e+00> : vector<2x16xf32>
    %10 = vector.multi_reduction <add>, %9, %cst_4 [2] : vector<2x16x16xf32> to vector<2x16xf32>
    %11 = vector.shape_cast %10 : vector<2x16xf32> to vector<2x16x1xf32>
    %cst_5 = arith.constant dense<0.000000e+00> : vector<2x1xf32>
    %12 = vector.multi_reduction <add>, %11, %cst_5 [1] : vector<2x16x1xf32> to vector<2x1xf32>
    %13 = vector.shape_cast %12 : vector<2x1xf32> to vector<2x1x1xf32>
    %cst_6 = arith.constant 3.906250e-03 : f32
    %14 = vector.broadcast %cst_6 : f32 to vector<2x1x1xf32>
    %15 = arith.mulf %13, %14 : vector<2x1x1xf32>
    %cst_7 = arith.constant 9.99999974E-6 : f32
    %16 = vector.broadcast %cst_7 : f32 to vector<2x1x1xf32>
    %17 = arith.addf %15, %16 : vector<2x1x1xf32>
    %18 = math.rsqrt %17 : vector<2x1x1xf32>
    %c0_8 = arith.constant 0 : index
    %c0_9 = arith.constant 0 : index
    %19 = vector.load %arg2[%c0_8, %c0_9] : memref<16x16xf32, #tpu.memory_space<vmem>>, vector<16x16xf32>
    %c0_10 = arith.constant 0 : index
    %c0_11 = arith.constant 0 : index
    %20 = vector.load %arg3[%c0_10, %c0_11] : memref<16x16xf32, #tpu.memory_space<vmem>>, vector<16x16xf32>
    %21 = vector.broadcast %18 : vector<2x1x1xf32> to vector<2x16x16xf32>
    %22 = arith.mulf %8, %21 : vector<2x16x16xf32>
    %23 = vector.shape_cast %19 : vector<16x16xf32> to vector<1x16x16xf32>
    %24 = vector.broadcast %23 : vector<1x16x16xf32> to vector<2x16x16xf32>
    %25 = arith.mulf %22, %24 : vector<2x16x16xf32>
    %26 = vector.shape_cast %20 : vector<16x16xf32> to vector<1x16x16xf32>
    %27 = vector.broadcast %26 : vector<1x16x16xf32> to vector<2x16x16xf32>
    %28 = arith.addf %25, %27 : vector<2x16x16xf32>
    %29 = vector.shape_cast %28 : vector<2x16x16xf32> to vector<32x16xf32>
    %30 = vector.shape_cast %0 : vector<2x16x16xf32> to vector<32x16xf32>
    %c0_12 = arith.constant 0 : index
    %c0_13 = arith.constant 0 : index
    %31 = vector.load %arg13[%c0_12, %c0_13] : memref<32x16xf32, #tpu.memory_space<vmem>>, vector<32x16xf32>
    tpu.vector_store %arg13[%c0_12, %c0_13], %30 {strides = array<i32>} : memref<32x16xf32, #tpu.memory_space<vmem>>, vector<32x16xf32>,
    %c0_14 = arith.constant 0 : index
    %c0_15 = arith.constant 0 : index
    %32 = vector.load %arg6[%c0_14, %c0_15] : memref<16x48xf32, #tpu.memory_space<vmem>>, vector<16x48xf32>
    %cst_16 = arith.constant dense<0.000000e+00> : vector<32x48xf32>
    %33 = tpu.matmul %29, %32, %cst_16 {dimension_numbers = #tpu.dot_dimension_numbers<[1], [0], [0], [1], [0, 0, 1, 1], [], []>} : vector<32x16xf32>, vector<16x48xf32>, vector<32x48xf32> -> vector<32x48xf32>
    %c0_17 = arith.constant 0 : index
    %c0_18 = arith.constant 0 : index
    %34 = vector.load %arg7[%c0_17, %c0_18] : memref<1x48xf32, #tpu.memory_space<vmem>>, vector<1x48xf32>
    %35 = vector.broadcast %34 : vector<1x48xf32> to vector<32x48xf32>
    %36 = arith.addf %33, %35 : vector<32x48xf32>
    %37 = vector.extract_strided_slice %36 {offsets = [0, 0], sizes = [32, 16], strides = [1, 1]} : vector<32x48xf32> to vector<32x16xf32>
    %38 = vector.extract_strided_slice %36 {offsets = [0, 16], sizes = [32, 16], strides = [1, 1]} : vector<32x48xf32> to vector<32x16xf32>
    %39 = vector.extract_strided_slice %36 {offsets = [0, 32], sizes = [32, 16], strides = [1, 1]} : vector<32x48xf32> to vector<32x16xf32>
    %40 = arith.negf %39 : vector<32x16xf32>
    %41 = math.exp %40 : vector<32x16xf32>
    %cst_19 = arith.constant 1.000000e+00 : f32
    %42 = vector.broadcast %cst_19 : f32 to vector<32x16xf32>
    %43 = arith.addf %42, %41 : vector<32x16xf32>
    %44 = arith.divf %42, %43 : vector<32x16xf32>
    %c0_20 = arith.constant 0 : index
    %c0_21 = arith.constant 0 : index
    %45 = vector.load %arg13[%c0_20, %c0_21] : memref<32x16xf32, #tpu.memory_space<vmem>>, vector<32x16xf32>
    %46 = arith.mulf %44, %37 : vector<32x16xf32>
    %47 = arith.mulf %46, %38 : vector<32x16xf32>
    %48 = arith.addf %45, %47 : vector<32x16xf32>
    %c0_22 = arith.constant 0 : index
    %c0_23 = arith.constant 0 : index
    %49 = vector.load %arg13[%c0_22, %c0_23] : memref<32x16xf32, #tpu.memory_space<vmem>>, vector<32x16xf32>
    tpu.vector_store %arg13[%c0_22, %c0_23], %48 {strides = array<i32>} : memref<32x16xf32, #tpu.memory_space<vmem>>, vector<32x16xf32>,
    %c0_24 = arith.constant 0 : index
    %c0_25 = arith.constant 0 : index
    %50 = vector.load %arg13[%c0_24, %c0_25] : memref<32x16xf32, #tpu.memory_space<vmem>>, vector<32x16xf32>
    %51 = vector.shape_cast %50 : vector<32x16xf32> to vector<2x16x16xf32>
    %cst_26 = arith.constant dense<0.000000e+00> : vector<2x16xf32>
    %52 = vector.multi_reduction <add>, %51, %cst_26 [2] : vector<2x16x16xf32> to vector<2x16xf32>
    %53 = vector.shape_cast %52 : vector<2x16xf32> to vector<2x16x1xf32>
    %cst_27 = arith.constant dense<0.000000e+00> : vector<2x1xf32>
    %54 = vector.multi_reduction <add>, %53, %cst_27 [1] : vector<2x16x1xf32> to vector<2x1xf32>
    %55 = vector.shape_cast %54 : vector<2x1xf32> to vector<2x1x1xf32>
    %cst_28 = arith.constant 3.906250e-03 : f32
    %56 = vector.broadcast %cst_28 : f32 to vector<2x1x1xf32>
    %57 = arith.mulf %55, %56 : vector<2x1x1xf32>
    %58 = vector.broadcast %57 : vector<2x1x1xf32> to vector<2x16x16xf32>
    %59 = arith.subf %51, %58 : vector<2x16x16xf32>
    %60 = arith.mulf %59, %59 : vector<2x16x16xf32>
    %cst_29 = arith.constant dense<0.000000e+00> : vector<2x16xf32>
    %61 = vector.multi_reduction <add>, %60, %cst_29 [2] : vector<2x16x16xf32> to vector<2x16xf32>
    %62 = vector.shape_cast %61 : vector<2x16xf32> to vector<2x16x1xf32>
    %cst_30 = arith.constant dense<0.000000e+00> : vector<2x1xf32>
    %63 = vector.multi_reduction <add>, %62, %cst_30 [1] : vector<2x16x1xf32> to vector<2x1xf32>
    %64 = vector.shape_cast %63 : vector<2x1xf32> to vector<2x1x1xf32>
    %cst_31 = arith.constant 3.906250e-03 : f32
    %65 = vector.broadcast %cst_31 : f32 to vector<2x1x1xf32>
    %66 = arith.mulf %64, %65 : vector<2x1x1xf32>
    %cst_32 = arith.constant 9.99999974E-6 : f32
    %67 = vector.broadcast %cst_32 : f32 to vector<2x1x1xf32>
    %68 = arith.addf %66, %67 : vector<2x1x1xf32>
    %69 = math.rsqrt %68 : vector<2x1x1xf32>
    %c0_33 = arith.constant 0 : index
    %c0_34 = arith.constant 0 : index
    %70 = vector.load %arg4[%c0_33, %c0_34] : memref<16x16xf32, #tpu.memory_space<vmem>>, vector<16x16xf32>
    %c0_35 = arith.constant 0 : index
    %c0_36 = arith.constant 0 : index
    %71 = vector.load %arg5[%c0_35, %c0_36] : memref<16x16xf32, #tpu.memory_space<vmem>>, vector<16x16xf32>
    %72 = vector.broadcast %69 : vector<2x1x1xf32> to vector<2x16x16xf32>
    %73 = arith.mulf %59, %72 : vector<2x16x16xf32>
    %74 = vector.shape_cast %70 : vector<16x16xf32> to vector<1x16x16xf32>
    %75 = vector.broadcast %74 : vector<1x16x16xf32> to vector<2x16x16xf32>
    %76 = arith.mulf %73, %75 : vector<2x16x16xf32>
    %77 = vector.shape_cast %71 : vector<16x16xf32> to vector<1x16x16xf32>
    %78 = vector.broadcast %77 : vector<1x16x16xf32> to vector<2x16x16xf32>
    %79 = arith.addf %76, %78 : vector<2x16x16xf32>
    %80 = vector.shape_cast %79 : vector<2x16x16xf32> to vector<32x16xf32>
    %c0_37 = arith.constant 0 : index
    %c0_38 = arith.constant 0 : index
    %81 = vector.load %arg13[%c0_37, %c0_38] : memref<32x16xf32, #tpu.memory_space<vmem>>, vector<32x16xf32>
    %c0_39 = arith.constant 0 : index
    %c0_40 = arith.constant 0 : index
    %82 = vector.load %arg11[%c0_39, %c0_40] : memref<1x16xf32, #tpu.memory_space<vmem>>, vector<1x16xf32>
    %83 = vector.shape_cast %82 : vector<1x16xf32> to vector<1x16xf32>
    %84 = vector.broadcast %83 : vector<1x16xf32> to vector<32x16xf32>
    %85 = arith.addf %81, %84 : vector<32x16xf32>
    %c0_41 = arith.constant 0 : index
    %c0_42 = arith.constant 0 : index
    %86 = vector.load %arg13[%c0_41, %c0_42] : memref<32x16xf32, #tpu.memory_space<vmem>>, vector<32x16xf32>
    tpu.vector_store %arg13[%c0_41, %c0_42], %85 {strides = array<i32>} : memref<32x16xf32, #tpu.memory_space<vmem>>, vector<32x16xf32>,
    %c0_43 = arith.constant 0 : index
    %c0_44 = arith.constant 0 : index
    %87 = vector.load %arg8[%c0_43, %c0_44] : memref<16x64xf32, #tpu.memory_space<vmem>>, vector<16x64xf32>
    %cst_45 = arith.constant dense<0.000000e+00> : vector<32x64xf32>
    %88 = tpu.matmul %80, %87, %cst_45 {dimension_numbers = #tpu.dot_dimension_numbers<[1], [0], [0], [1], [0, 0, 1, 1], [], []>} : vector<32x16xf32>, vector<16x64xf32>, vector<32x64xf32> -> vector<32x64xf32>
    %c0_46 = arith.constant 0 : index
    %c0_47 = arith.constant 0 : index
    %89 = vector.load %arg9[%c0_46, %c0_47] : memref<1x64xf32, #tpu.memory_space<vmem>>, vector<1x64xf32>
    %90 = vector.broadcast %89 : vector<1x64xf32> to vector<32x64xf32>
    %91 = arith.addf %88, %90 : vector<32x64xf32>
    %cst_48 = arith.constant 5.000000e-01 : f32
    %92 = vector.broadcast %cst_48 : f32 to vector<32x64xf32>
    %93 = arith.mulf %92, %91 : vector<32x64xf32>
    %cst_49 = arith.constant 0.707106769 : f32
    %94 = vector.broadcast %cst_49 : f32 to vector<32x64xf32>
    %95 = arith.mulf %91, %94 : vector<32x64xf32>
    %96 = math.erf %95 : vector<32x64xf32>
    %cst_50 = arith.constant 1.000000e+00 : f32
    %97 = vector.broadcast %cst_50 : f32 to vector<32x64xf32>
    %98 = arith.addf %97, %96 : vector<32x64xf32>
    %99 = arith.mulf %93, %98 : vector<32x64xf32>
    %c0_51 = arith.constant 0 : index
    %c0_52 = arith.constant 0 : index
    %100 = vector.load %arg13[%c0_51, %c0_52] : memref<32x16xf32, #tpu.memory_space<vmem>>, vector<32x16xf32>
    %c0_53 = arith.constant 0 : index
    %c0_54 = arith.constant 0 : index
    %101 = vector.load %arg10[%c0_53, %c0_54] : memref<64x16xf32, #tpu.memory_space<vmem>>, vector<64x16xf32>
    %cst_55 = arith.constant dense<0.000000e+00> : vector<32x16xf32>
    %102 = tpu.matmul %99, %101, %cst_55 {dimension_numbers = #tpu.dot_dimension_numbers<[1], [0], [0], [1], [0, 0, 1, 1], [], []>} : vector<32x64xf32>, vector<64x16xf32>, vector<32x16xf32> -> vector<32x16xf32>
    %103 = arith.addf %100, %102 : vector<32x16xf32>
    %c0_56 = arith.constant 0 : index
    %c0_57 = arith.constant 0 : index
    %104 = vector.load %arg13[%c0_56, %c0_57] : memref<32x16xf32, #tpu.memory_space<vmem>>, vector<32x16xf32>
    tpu.vector_store %arg13[%c0_56, %c0_57], %103 {strides = array<i32>} : memref<32x16xf32, #tpu.memory_space<vmem>>, vector<32x16xf32>,
    %c0_58 = arith.constant 0 : index
    %c0_59 = arith.constant 0 : index
    %105 = vector.load %arg13[%c0_58, %c0_59] : memref<32x16xf32, #tpu.memory_space<vmem>>, vector<32x16xf32>
    %106 = vector.shape_cast %105 : vector<32x16xf32> to vector<2x16x16xf32>
    %c0_60 = arith.constant 0 : index
    %c0_61 = arith.constant 0 : index
    %c0_62 = arith.constant 0 : index
    %107 = vector.load %arg12[%c0_60, %c0_61, %c0_62] : memref<2x16x16xf32, #tpu.memory_space<vmem>>, vector<2x16x16xf32>
    tpu.vector_store %arg12[%c0_60, %c0_61, %c0_62], %106 {strides = array<i32>} : memref<2x16x16xf32, #tpu.memory_space<vmem>>, vector<2x16x16xf32>,
    return
  }
  func.func @transform_0(%arg0: i32) -> (i32, i32, i32) {
    %c0_i32 = arith.constant 0 : i32
    %c0_i32_0 = arith.constant 0 : i32
    %c0_i32_1 = arith.constant 0 : i32
    return %arg0, %c0_i32, %c0_i32_0 : i32, i32, i32
  }
  func.func @transform_1(%arg0: i32) -> (i32, i32) {
    %c0_i32 = arith.constant 0 : i32
    %c0_i32_0 = arith.constant 0 : i32
    %c0_i32_1 = arith.constant 0 : i32
    return %c0_i32, %c0_i32_0 : i32, i32
  }
  func.func @transform_2(%arg0: i32) -> (i32, i32) {
    %c0_i32 = arith.constant 0 : i32
    %c0_i32_0 = arith.constant 0 : i32
    %c0_i32_1 = arith.constant 0 : i32
    return %c0_i32, %c0_i32_0 : i32, i32
  }
  func.func @transform_3(%arg0: i32) -> (i32, i32) {
    %c0_i32 = arith.constant 0 : i32
    %c0_i32_0 = arith.constant 0 : i32
    %c0_i32_1 = arith.constant 0 : i32
    return %c0_i32, %c0_i32_0 : i32, i32
  }
  func.func @transform_4(%arg0: i32) -> (i32, i32) {
    %c0_i32 = arith.constant 0 : i32
    %c0_i32_0 = arith.constant 0 : i32
    %c0_i32_1 = arith.constant 0 : i32
    return %c0_i32, %c0_i32_0 : i32, i32
  }
  func.func @transform_5(%arg0: i32) -> (i32, i32) {
    %c0_i32 = arith.constant 0 : i32
    %c0_i32_0 = arith.constant 0 : i32
    %c0_i32_1 = arith.constant 0 : i32
    return %c0_i32, %c0_i32_0 : i32, i32
  }
  func.func @transform_6(%arg0: i32) -> (i32, i32) {
    %c0_i32 = arith.constant 0 : i32
    %c0_i32_0 = arith.constant 0 : i32
    %c0_i32_1 = arith.constant 0 : i32
    return %c0_i32, %c0_i32_0 : i32, i32
  }
  func.func @transform_7(%arg0: i32) -> (i32, i32) {
    %c0_i32 = arith.constant 0 : i32
    %c0_i32_0 = arith.constant 0 : i32
    %c0_i32_1 = arith.constant 0 : i32
    return %c0_i32, %c0_i32_0 : i32, i32
  }
  func.func @transform_8(%arg0: i32) -> (i32, i32) {
    %c0_i32 = arith.constant 0 : i32
    %c0_i32_0 = arith.constant 0 : i32
    %c0_i32_1 = arith.constant 0 : i32
    return %c0_i32, %c0_i32_0 : i32, i32
  }
  func.func @transform_9(%arg0: i32) -> (i32, i32) {
    %c0_i32 = arith.constant 0 : i32
    %c0_i32_0 = arith.constant 0 : i32
    %c0_i32_1 = arith.constant 0 : i32
    return %c0_i32, %c0_i32_0 : i32, i32
  }
  func.func @transform_10(%arg0: i32) -> (i32, i32) {
    %c0_i32 = arith.constant 0 : i32
    %c0_i32_0 = arith.constant 0 : i32
    %c0_i32_1 = arith.constant 0 : i32
    return %c0_i32, %c0_i32_0 : i32, i32
  }
  func.func @transform_11(%arg0: i32) -> (i32, i32, i32) {
    %c0_i32 = arith.constant 0 : i32
    %c0_i32_0 = arith.constant 0 : i32
    %c0_i32_1 = arith.constant 0 : i32
    return %arg0, %c0_i32, %c0_i32_0 : i32, i32, i32
  }
}

module attributes {stable_mosaic.version = 11 : i64} {
  func.func @_rwkv_kernel(%arg0: i32, %arg1: memref<2x16x16xf32, #tpu.memory_space<vmem>>, %arg2: memref<16x16xf32, #tpu.memory_space<vmem>>, %arg3: memref<16x16xf32, #tpu.memory_space<vmem>>, %arg4: memref<16x16xf32, #tpu.memory_space<vmem>>, %arg5: memref<16x16xf32, #tpu.memory_space<vmem>>, %arg6: memref<16x48xf32, #tpu.memory_space<vmem>>, %arg7: memref<1x48xf32, #tpu.memory_space<vmem>>, %arg8: memref<16x64xf32, #tpu.memory_space<vmem>>, %arg9: memref<1x64xf32, #tpu.memory_space<vmem>>, %arg10: memref<64x16xf32, #tpu.memory_space<vmem>>, %arg11: memref<1x16xf32, #tpu.memory_space<vmem>>, %arg12: memref<2x16x16xf32, #tpu.memory_space<vmem>>, %arg13: memref<32x16xf32, #tpu.memory_space<vmem>>) attributes {dimension_semantics = [#tpu.dimension_semantics<parallel>], iteration_bounds = array<i64: 1>, scalar_prefetch = 0 : i64, scratch_operands = 1 : i64, tpu.core_type = #tpu.core_type<tc>, window_params = [{transform_indices = @transform_0, window_bounds = array<i64: 2, 16, 16>}, {pipeline_mode = #tpu.pipeline_mode<synchronous>, transform_indices = @transform_1, window_bounds = array<i64: 16, 16>}, {pipeline_mode = #tpu.pipeline_mode<synchronous>, transform_indices = @transform_2, window_bounds = array<i64: 16, 16>}, {pipeline_mode = #tpu.pipeline_mode<synchronous>, transform_indices = @transform_3, window_bounds = array<i64: 16, 16>}, {pipeline_mode = #tpu.pipeline_mode<synchronous>, transform_indices = @transform_4, window_bounds = array<i64: 16, 16>}, {pipeline_mode = #tpu.pipeline_mode<synchronous>, transform_indices = @transform_5, window_bounds = array<i64: 16, 48>}, {pipeline_mode = #tpu.pipeline_mode<synchronous>, transform_indices = @transform_6, window_bounds = array<i64: 1, 48>}, {pipeline_mode = #tpu.pipeline_mode<synchronous>, transform_indices = @transform_7, window_bounds = array<i64: 16, 64>}, {pipeline_mode = #tpu.pipeline_mode<synchronous>, transform_indices = @transform_8, window_bounds = array<i64: 1, 64>}, {pipeline_mode = #tpu.pipeline_mode<synchronous>, transform_indices = @transform_9, window_bounds = array<i64: 64, 16>}, {pipeline_mode = #tpu.pipeline_mode<synchronous>, transform_indices = @transform_10, window_bounds = array<i64: 1, 16>}, {transform_indices = @transform_11, window_bounds = array<i64: 2, 16, 16>}]} {
    %c0 = arith.constant 0 : index
    %c0_0 = arith.constant 0 : index
    %c0_1 = arith.constant 0 : index
    %0 = vector.load %arg1[%c0, %c0_0, %c0_1] : memref<2x16x16xf32, #tpu.memory_space<vmem>>, vector<2x16x16xf32>
    %cst = arith.constant dense<0.000000e+00> : vector<2x16xf32>
    %1 = vector.multi_reduction <add>, %0, %cst [2] : vector<2x16x16xf32> to vector<2x16xf32>
    %2 = vector.shape_cast %1 : vector<2x16xf32> to vector<2x16x1xf32>
    %cst_2 = arith.constant dense<0.000000e+00> : vector<2x1xf32>
    %3 = vector.multi_reduction <add>, %2, %cst_2 [1] : vector<2x16x1xf32> to vector<2x1xf32>
    %4 = vector.shape_cast %3 : vector<2x1xf32> to vector<2x1x1xf32>
    %cst_3 = arith.constant 3.906250e-03 : f32
    %5 = vector.broadcast %cst_3 : f32 to vector<2x1x1xf32>
    %6 = arith.mulf %4, %5 : vector<2x1x1xf32>
    %7 = vector.broadcast %6 : vector<2x1x1xf32> to vector<2x16x16xf32>
    %8 = arith.subf %0, %7 : vector<2x16x16xf32>
    %9 = arith.mulf %8, %8 : vector<2x16x16xf32>
    %cst_4 = arith.constant dense<0.000000e+00> : vector<2x16xf32>
    %10 = vector.multi_reduction <add>, %9, %cst_4 [2] : vector<2x16x16xf32> to vector<2x16xf32>
    %11 = vector.shape_cast %10 : vector<2x16xf32> to vector<2x16x1xf32>
    %cst_5 = arith.constant dense<0.000000e+00> : vector<2x1xf32>
    %12 = vector.multi_reduction <add>, %11, %cst_5 [1] : vector<2x16x1xf32> to vector<2x1xf32>
    %13 = vector.shape_cast %12 : vector<2x1xf32> to vector<2x1x1xf32>
    %cst_6 = arith.constant 3.906250e-03 : f32
    %14 = vector.broadcast %cst_6 : f32 to vector<2x1x1xf32>
    %15 = arith.mulf %13, %14 : vector<2x1x1xf32>
    %cst_7 = arith.constant 9.99999974E-6 : f32
    %16 = vector.broadcast %cst_7 : f32 to vector<2x1x1xf32>
    %17 = arith.addf %15, %16 : vector<2x1x1xf32>
    %18 = math.rsqrt %17 : vector<2x1x1xf32>
    %c0_8 = arith.constant 0 : index
    %c0_9 = arith.constant 0 : index
    %19 = vector.load %arg2[%c0_8, %c0_9] : memref<16x16xf32, #tpu.memory_space<vmem>>, vector<16x16xf32>
    %c0_10 = arith.constant 0 : index
    %c0_11 = arith.constant 0 : index
    %20 = vector.load %arg3[%c0_10, %c0_11] : memref<16x16xf32, #tpu.memory_space<vmem>>, vector<16x16xf32>
    %21 = vector.broadcast %18 : vector<2x1x1xf32> to vector<2x16x16xf32>
    %22 = arith.mulf %8, %21 : vector<2x16x16xf32>
    %23 = vector.shape_cast %19 : vector<16x16xf32> to vector<1x16x16xf32>
    %24 = vector.broadcast %23 : vector<1x16x16xf32> to vector<2x16x16xf32>
    %25 = arith.mulf %22, %24 : vector<2x16x16xf32>
    %26 = vector.shape_cast %20 : vector<16x16xf32> to vector<1x16x16xf32>
    %27 = vector.broadcast %26 : vector<1x16x16xf32> to vector<2x16x16xf32>
    %28 = arith.addf %25, %27 : vector<2x16x16xf32>
    %29 = vector.shape_cast %28 : vector<2x16x16xf32> to vector<32x16xf32>
    %30 = vector.shape_cast %0 : vector<2x16x16xf32> to vector<32x16xf32>
    %c0_12 = arith.constant 0 : index
    %c0_13 = arith.constant 0 : index
    %31 = vector.load %arg13[%c0_12, %c0_13] : memref<32x16xf32, #tpu.memory_space<vmem>>, vector<32x16xf32>
    tpu.vector_store %arg13[%c0_12, %c0_13], %30 {strides = array<i32>} : memref<32x16xf32, #tpu.memory_space<vmem>>, vector<32x16xf32>,
    %c0_14 = arith.constant 0 : index
    %c0_15 = arith.constant 0 : index
    %32 = vector.load %arg6[%c0_14, %c0_15] : memref<16x48xf32, #tpu.memory_space<vmem>>, vector<16x48xf32>
    %cst_16 = arith.constant dense<0.000000e+00> : vector<32x48xf32>
    %33 = tpu.matmul %29, %32, %cst_16 {dimension_numbers = #tpu.dot_dimension_numbers<[1], [0], [0], [1], [0, 0, 1, 1], [], []>} : vector<32x16xf32>, vector<16x48xf32>, vector<32x48xf32> -> vector<32x48xf32>
    %c0_17 = arith.constant 0 : index
    %c0_18 = arith.constant 0 : index
    %34 = vector.load %arg7[%c0_17, %c0_18] : memref<1x48xf32, #tpu.memory_space<vmem>>, vector<1x48xf32>
    %35 = vector.broadcast %34 : vector<1x48xf32> to vector<32x48xf32>
    %36 = arith.addf %33, %35 : vector<32x48xf32>
    %37 = vector.extract_strided_slice %36 {offsets = [0, 0], sizes = [32, 16], strides = [1, 1]} : vector<32x48xf32> to vector<32x16xf32>
    %38 = vector.extract_strided_slice %36 {offsets = [0, 16], sizes = [32, 16], strides = [1, 1]} : vector<32x48xf32> to vector<32x16xf32>
    %39 = vector.extract_strided_slice %36 {offsets = [0, 32], sizes = [32, 16], strides = [1, 1]} : vector<32x48xf32> to vector<32x16xf32>
    %40 = arith.negf %39 : vector<32x16xf32>
    %41 = math.exp %40 : vector<32x16xf32>
    %cst_19 = arith.constant 1.000000e+00 : f32
    %42 = vector.broadcast %cst_19 : f32 to vector<32x16xf32>
    %43 = arith.addf %42, %41 : vector<32x16xf32>
    %44 = arith.divf %42, %43 : vector<32x16xf32>
    %c0_20 = arith.constant 0 : index
    %c0_21 = arith.constant 0 : index
    %45 = vector.load %arg13[%c0_20, %c0_21] : memref<32x16xf32, #tpu.memory_space<vmem>>, vector<32x16xf32>
    %46 = arith.mulf %44, %37 : vector<32x16xf32>
    %47 = arith.mulf %46, %38 : vector<32x16xf32>
    %48 = arith.addf %45, %47 : vector<32x16xf32>
    %c0_22 = arith.constant 0 : index
    %c0_23 = arith.constant 0 : index
    %49 = vector.load %arg13[%c0_22, %c0_23] : memref<32x16xf32, #tpu.memory_space<vmem>>, vector<32x16xf32>
    tpu.vector_store %arg13[%c0_22, %c0_23], %48 {strides = array<i32>} : memref<32x16xf32, #tpu.memory_space<vmem>>, vector<32x16xf32>,
    %c0_24 = arith.constant 0 : index
    %c0_25 = arith.constant 0 : index
    %50 = vector.load %arg13[%c0_24, %c0_25] : memref<32x16xf32, #tpu.memory_space<vmem>>, vector<32x16xf32>
    %51 = vector.shape_cast %50 : vector<32x16xf32> to vector<2x16x16xf32>
    %cst_26 = arith.constant dense<0.000000e+00> : vector<2x16xf32>
    %52 = vector.multi_reduction <add>, %51, %cst_26 [2] : vector<2x16x16xf32> to vector<2x16xf32>
    %53 = vector.shape_cast %52 : vector<2x16xf32> to vector<2x16x1xf32>
    %cst_27 = arith.constant dense<0.000000e+00> : vector<2x1xf32>
    %54 = vector.multi_reduction <add>, %53, %cst_27 [1] : vector<2x16x1xf32> to vector<2x1xf32>
    %55 = vector.shape_cast %54 : vector<2x1xf32> to vector<2x1x1xf32>
    %cst_28 = arith.constant 3.906250e-03 : f32
    %56 = vector.broadcast %cst_28 : f32 to vector<2x1x1xf32>
    %57 = arith.mulf %55, %56 : vector<2x1x1xf32>
    %58 = vector.broadcast %57 : vector<2x1x1xf32> to vector<2x16x16xf32>
    %59 = arith.subf %51, %58 : vector<2x16x16xf32>
    %60 = arith.mulf %59, %59 : vector<2x16x16xf32>
    %cst_29 = arith.constant dense<0.000000e+00> : vector<2x16xf32>
    %61 = vector.multi_reduction <add>, %60, %cst_29 [2] : vector<2x16x16xf32> to vector<2x16xf32>
    %62 = vector.shape_cast %61 : vector<2x16xf32> to vector<2x16x1xf32>
    %cst_30 = arith.constant dense<0.000000e+00> : vector<2x1xf32>
    %63 = vector.multi_reduction <add>, %62, %cst_30 [1] : vector<2x16x1xf32> to vector<2x1xf32>
    %64 = vector.shape_cast %63 : vector<2x1xf32> to vector<2x1x1xf32>
    %cst_31 = arith.constant 3.906250e-03 : f32
    %65 = vector.broadcast %cst_31 : f32 to vector<2x1x1xf32>
    %66 = arith.mulf %64, %65 : vector<2x1x1xf32>
    %cst_32 = arith.constant 9.99999974E-6 : f32
    %67 = vector.broadcast %cst_32 : f32 to vector<2x1x1xf32>
    %68 = arith.addf %66, %67 : vector<2x1x1xf32>
    %69 = math.rsqrt %68 : vector<2x1x1xf32>
    %c0_33 = arith.constant 0 : index
    %c0_34 = arith.constant 0 : index
    %70 = vector.load %arg4[%c0_33, %c0_34] : memref<16x16xf32, #tpu.memory_space<vmem>>, vector<16x16xf32>
    %c0_35 = arith.constant 0 : index
    %c0_36 = arith.constant 0 : index
    %71 = vector.load %arg5[%c0_35, %c0_36] : memref<16x16xf32, #tpu.memory_space<vmem>>, vector<16x16xf32>
    %72 = vector.broadcast %69 : vector<2x1x1xf32> to vector<2x16x16xf32>
    %73 = arith.mulf %59, %72 : vector<2x16x16xf32>
    %74 = vector.shape_cast %70 : vector<16x16xf32> to vector<1x16x16xf32>
    %75 = vector.broadcast %74 : vector<1x16x16xf32> to vector<2x16x16xf32>
    %76 = arith.mulf %73, %75 : vector<2x16x16xf32>
    %77 = vector.shape_cast %71 : vector<16x16xf32> to vector<1x16x16xf32>
    %78 = vector.broadcast %77 : vector<1x16x16xf32> to vector<2x16x16xf32>
    %79 = arith.addf %76, %78 : vector<2x16x16xf32>
    %80 = vector.shape_cast %79 : vector<2x16x16xf32> to vector<32x16xf32>
    %c0_37 = arith.constant 0 : index
    %c0_38 = arith.constant 0 : index
    %81 = vector.load %arg13[%c0_37, %c0_38] : memref<32x16xf32, #tpu.memory_space<vmem>>, vector<32x16xf32>
    %c0_39 = arith.constant 0 : index
    %c0_40 = arith.constant 0 : index
    %82 = vector.load %arg11[%c0_39, %c0_40] : memref<1x16xf32, #tpu.memory_space<vmem>>, vector<1x16xf32>
    %83 = vector.shape_cast %82 : vector<1x16xf32> to vector<1x16xf32>
    %84 = vector.broadcast %83 : vector<1x16xf32> to vector<32x16xf32>
    %85 = arith.addf %81, %84 : vector<32x16xf32>
    %c0_41 = arith.constant 0 : index
    %c0_42 = arith.constant 0 : index
    %86 = vector.load %arg13[%c0_41, %c0_42] : memref<32x16xf32, #tpu.memory_space<vmem>>, vector<32x16xf32>
    tpu.vector_store %arg13[%c0_41, %c0_42], %85 {strides = array<i32>} : memref<32x16xf32, #tpu.memory_space<vmem>>, vector<32x16xf32>,
    %c0_43 = arith.constant 0 : index
    %c0_44 = arith.constant 0 : index
    %87 = vector.load %arg8[%c0_43, %c0_44] : memref<16x64xf32, #tpu.memory_space<vmem>>, vector<16x64xf32>
    %cst_45 = arith.constant dense<0.000000e+00> : vector<32x64xf32>
    %88 = tpu.matmul %80, %87, %cst_45 {dimension_numbers = #tpu.dot_dimension_numbers<[1], [0], [0], [1], [0, 0, 1, 1], [], []>} : vector<32x16xf32>, vector<16x64xf32>, vector<32x64xf32> -> vector<32x64xf32>
    %c0_46 = arith.constant 0 : index
    %c0_47 = arith.constant 0 : index
    %89 = vector.load %arg9[%c0_46, %c0_47] : memref<1x64xf32, #tpu.memory_space<vmem>>, vector<1x64xf32>
    %90 = vector.broadcast %89 : vector<1x64xf32> to vector<32x64xf32>
    %91 = arith.addf %88, %90 : vector<32x64xf32>
    %cst_48 = arith.constant 5.000000e-01 : f32
    %92 = vector.broadcast %cst_48 : f32 to vector<32x64xf32>
    %93 = arith.mulf %92, %91 : vector<32x64xf32>
    %cst_49 = arith.constant 0.707106769 : f32
    %94 = vector.broadcast %cst_49 : f32 to vector<32x64xf32>
    %95 = arith.mulf %91, %94 : vector<32x64xf32>
    %96 = math.erf %95 : vector<32x64xf32>
    %cst_50 = arith.constant 1.000000e+00 : f32
    %97 = vector.broadcast %cst_50 : f32 to vector<32x64xf32>
    %98 = arith.addf %97, %96 : vector<32x64xf32>
    %99 = arith.mulf %93, %98 : vector<32x64xf32>
    %c0_51 = arith.constant 0 : index
    %c0_52 = arith.constant 0 : index
    %100 = vector.load %arg13[%c0_51, %c0_52] : memref<32x16xf32, #tpu.memory_space<vmem>>, vector<32x16xf32>
    %c0_53 = arith.constant 0 : index
    %c0_54 = arith.constant 0 : index
    %101 = vector.load %arg10[%c0_53, %c0_54] : memref<64x16xf32, #tpu.memory_space<vmem>>, vector<64x16xf32>
    %cst_55 = arith.constant dense<0.000000e+00> : vector<32x16xf32>
    %102 = tpu.matmul %99, %101, %cst_55 {dimension_numbers = #tpu.dot_dimension_numbers<[1], [0], [0], [1], [0, 0, 1, 1], [], []>} : vector<32x64xf32>, vector<64x16xf32>, vector<32x16xf32> -> vector<32x16xf32>
    %103 = arith.addf %100, %102 : vector<32x16xf32>
    %c0_56 = arith.constant 0 : index
    %c0_57 = arith.constant 0 : index
    %104 = vector.load %arg13[%c0_56, %c0_57] : memref<32x16xf32, #tpu.memory_space<vmem>>, vector<32x16xf32>
    tpu.vector_store %arg13[%c0_56, %c0_57], %103 {strides = array<i32>} : memref<32x16xf32, #tpu.memory_space<vmem>>, vector<32x16xf32>,
    %c0_58 = arith.constant 0 : index
    %c0_59 = arith.constant 0 : index
    %105 = vector.load %arg13[%c0_58, %c0_59] : memref<32x16xf32, #tpu.memory_space<vmem>>, vector<32x16xf32>
    %106 = vector.shape_cast %105 : vector<32x16xf32> to vector<2x16x16xf32>
    %c0_60 = arith.constant 0 : index
    %c0_61 = arith.constant 0 : index
    %c0_62 = arith.constant 0 : index
    %107 = vector.load %arg12[%c0_60, %c0_61, %c0_62] : memref<2x16x16xf32, #tpu.memory_space<vmem>>, vector<2x16x16xf32>
    tpu.vector_store %arg12[%c0_60, %c0_61, %c0_62], %106 {strides = array<i32>} : memref<2x16x16xf32, #tpu.memory_space<vmem>>, vector<2x16x16xf32>,
    return
  }
  func.func @transform_0(%arg0: i32) -> (i32, i32, i32) {
    %c0_i32 = arith.constant 0 : i32
    %c0_i32_0 = arith.constant 0 : i32
    %c0_i32_1 = arith.constant 0 : i32
    return %arg0, %c0_i32, %c0_i32_0 : i32, i32, i32
  }
  func.func @transform_1(%arg0: i32) -> (i32, i32) {
    %c0_i32 = arith.constant 0 : i32
    %c0_i32_0 = arith.constant 0 : i32
    %c0_i32_1 = arith.constant 0 : i32
    return %c0_i32, %c0_i32_0 : i32, i32
  }
  func.func @transform_2(%arg0: i32) -> (i32, i32) {
    %c0_i32 = arith.constant 0 : i32
    %c0_i32_0 = arith.constant 0 : i32
    %c0_i32_1 = arith.constant 0 : i32
    return %c0_i32, %c0_i32_0 : i32, i32
  }
  func.func @transform_3(%arg0: i32) -> (i32, i32) {
    %c0_i32 = arith.constant 0 : i32
    %c0_i32_0 = arith.constant 0 : i32
    %c0_i32_1 = arith.constant 0 : i32
    return %c0_i32, %c0_i32_0 : i32, i32
  }
  func.func @transform_4(%arg0: i32) -> (i32, i32) {
    %c0_i32 = arith.constant 0 : i32
    %c0_i32_0 = arith.constant 0 : i32
    %c0_i32_1 = arith.constant 0 : i32
    return %c0_i32, %c0_i32_0 : i32, i32
  }
  func.func @transform_5(%arg0: i32) -> (i32, i32) {
    %c0_i32 = arith.constant 0 : i32
    %c0_i32_0 = arith.constant 0 : i32
    %c0_i32_1 = arith.constant 0 : i32
    return %c0_i32, %c0_i32_0 : i32, i32
  }
  func.func @transform_6(%arg0: i32) -> (i32, i32) {
    %c0_i32 = arith.constant 0 : i32
    %c0_i32_0 = arith.constant 0 : i32
    %c0_i32_1 = arith.constant 0 : i32
    return %c0_i32, %c0_i32_0 : i32, i32
  }
  func.func @transform_7(%arg0: i32) -> (i32, i32) {
    %c0_i32 = arith.constant 0 : i32
    %c0_i32_0 = arith.constant 0 : i32
    %c0_i32_1 = arith.constant 0 : i32
    return %c0_i32, %c0_i32_0 : i32, i32
  }
  func.func @transform_8(%arg0: i32) -> (i32, i32) {
    %c0_i32 = arith.constant 0 : i32
    %c0_i32_0 = arith.constant 0 : i32
    %c0_i32_1 = arith.constant 0 : i32
    return %c0_i32, %c0_i32_0 : i32, i32
  }
  func.func @transform_9(%arg0: i32) -> (i32, i32) {
    %c0_i32 = arith.constant 0 : i32
    %c0_i32_0 = arith.constant 0 : i32
    %c0_i32_1 = arith.constant 0 : i32
    return %c0_i32, %c0_i32_0 : i32, i32
  }
  func.func @transform_10(%arg0: i32) -> (i32, i32) {
    %c0_i32 = arith.constant 0 : i32
    %c0_i32_0 = arith.constant 0 : i32
    %c0_i32_1 = arith.constant 0 : i32
    return %c0_i32, %c0_i32_0 : i32, i32
  }
  func.func @transform_11(%arg0: i32) -> (i32, i32, i32) {
    %c0_i32 = arith.constant 0 : i32
    %c0_i32_0 = arith.constant 0 : i32
    %c0_i32_1 = arith.constant 0 : i32
    return %arg0, %c0_i32, %c0_i32_0 : i32, i32, i32
  }
}

</mosaic_0001>

<bundles_post_ra>
// kernel: tpu_custom_call.1
= control target key start
LH: loop header
LB: loop body
LE: loop exit
PB: predicated region body
PF: predicated region fallthrough
CT: control target
= control target key end

     0   :  { %16 = vsyncpa [#allocation4], 0  ;;  %s1174_s0 = inlined_call_operand.vmem [shape: f32[2,16,16], index: 0, kind: input, shape index: {}]   ;;  %s1175_s1 = inlined_call_operand.vmem [shape: f32[16,16], index: 1, kind: input, shape index: {}]   ;;  %s1176_s2 = inlined_call_operand.vmem [shape: f32[16,16], index: 2, kind: input, shape index: {}]   ;;  %s1177_s3 = inlined_call_operand.vmem [shape: f32[16,16], index: 3, kind: input, shape index: {}]   ;;  %s1178_s4 = inlined_call_operand.hbm [shape: f32[16,16], index: 4, kind: input, shape index: {}]   ;;  %s1179_s5 = inlined_call_operand.vmem [shape: f32[16,48], index: 5, kind: input, shape index: {}]   ;;  %s1180_s6 = inlined_call_operand.vmem [shape: f32[1,48], index: 6, kind: input, shape index: {}]   ;;  %s1181_s7 = inlined_call_operand.hbm [shape: f32[16,64], index: 7, kind: input, shape index: {}]   ;;  %s1182_s8 = inlined_call_operand.vmem [shape: f32[1,64], index: 8, kind: input, shape index: {}]   ;;  %s1183_s9 = inlined_call_operand.vmem [shape: f32[64,16], index: 9, kind: input, shape index: {}]   ;;  %s1184_s10 = inlined_call_operand.vmem [shape: f32[1,16], index: 10, kind: input, shape index: {}]   ;;  %s1185_s11 = inlined_call_operand.hbm [shape: f32[2,16,16], index: 11, kind: output, shape index: {}]  }
   0x1   :  { %17 = vsyncpa [#allocation7], 0 }
   0x2   :  { %18 = vsyncpa [#allocation5], 0  ;;  %s948_s17 = smov [#allocation3]   ;;  %s876_s21 = scalar_lea.hbm %s1178_s4, 256 }
   0x3   :  { %s32_s18 = sshll.u32 %s948_s17, 4  ;;  %p877_p0 = scmp.ne.s32.totalorder %s1178_s4, %s876_s21  ;;  %s33_s18 = int_to_ptr.vmem [resolvable:$true] %s32_s18 }
   0x4   :  { %p880_p1 = scmp.lt.u32.totalorder %s876_s21, %s1178_s4 }
   0x6   :  { %p882_p2 = pnand %p880_p1, %p877_p0 }
   0x8   :  { %885 = shalt.err (!%p882_p2)
}
   0x9   :  { %s886_s26 = scalar_lea.vmem %s33_s18, 256  ;;  %p891_p4 = scmp.lt.s32.totalorder %s33_s18, %s33_s18 }
   0xa   :  { %p887_p3 = scmp.ne.s32.totalorder %s33_s18, %s886_s26  ;;  %p892_p5 = scmp.lt.s32.totalorder %s886_s26, %s886_s26 }
   0xc   :  { %p893_p6 = por %p892_p5, %p891_p4 }
   0xe   :  { %p894_p7 = pnand %p893_p6, %p887_p3 }
  0x10   :  { %897 = shalt.err (!%p894_p7)
}
  0x11   :  { %s949_s27 = smov 128   ;;  %s950_s28 = smov 8  }
  0x12   :  { %38 = dma.hbm_to_vmem [thread:$0]  %s1178_s4, 256, %s33_s18, [#allocation4], %s949_s27, %s949_s27, %s950_s28  }
  0x13   :  { %s951_s12 = smov [#allocation6]   ;;  %s898_s16 = scalar_lea.hbm %s1181_s7, 256 }
  0x14   :  { %s48_s13 = sshll.u32 %s951_s12, 4  ;;  %p899_p8 = scmp.ne.s32.totalorder %s1181_s7, %s898_s16  ;;  %s49_s13 = int_to_ptr.vmem [resolvable:$true] %s48_s13 }
  0x15   :  { %p902_p9 = scmp.lt.u32.totalorder %s898_s16, %s1181_s7 }
  0x17   :  { %p904_p10 = pnand %p902_p9, %p899_p8 }
  0x19   :  { %907 = shalt.err (!%p904_p10)
}
  0x1a   :  { %s908_s22 = scalar_lea.vmem %s49_s13, 256  ;;  %p913_p12 = scmp.lt.s32.totalorder %s49_s13, %s49_s13 }
  0x1b   :  { %p909_p11 = scmp.ne.s32.totalorder %s49_s13, %s908_s22  ;;  %p914_p13 = scmp.lt.s32.totalorder %s908_s22, %s908_s22 }
  0x1d   :  { %p915_p0 = por %p914_p13, %p913_p12 }
  0x1f   :  { %p916_p1 = pnand %p915_p0, %p909_p11 }
  0x21   :  { %919 = shalt.err (!%p916_p1)
}
  0x22   :  { %54 = dma.hbm_to_vmem [thread:$0]  %s1181_s7, 256, %s49_s13, [#allocation7], %s949_s27, %s949_s27, %s950_s28  }
  0x23   :  { %942 = dma.done.wait [#allocation4], 256  }
  0x24   :  { %943 = vsyncadd [#allocation4], 4294967040 }
  0x25   :  { %944 = dma.done.wait [#allocation7], 256  }
  0x26   :  { %945 = vsyncadd [#allocation7], 4294967040  ;;  %vm71_vm0 = vcmask 130048   ;;  %v69_v0 = vld [vmem:[%s1174_s0 + $0x10] sm:$0xff]  ;;  %v67_v1 = vld [vmem:[%s1174_s0] sm:$0xff]  ;;  %s952_s18 = smov 32  }
  0x27   :  { %v70_v2 = vld [vmem:[%s1174_s0 + $0x18] sm:$0xff]  ;;  %v78_v3 = vsel %vm71_vm0, %v69_v0, 0.0  ;;  %158 = vst.msk [vmem:[#allocation2 + $0x10] sm:$0xff] %vm71_vm0, %v69_v0  ;;  %v72_v4 = vsel %vm71_vm0, %v67_v1, 0.0  ;;  %156 = vst.msk [vmem:[#allocation2] sm:$0xff] %vm71_vm0, %v67_v1  ;;  %v68_v5 = vld [vmem:[%s1174_s0 + $0x8] sm:$0xff] }
  0x28   :  { %159 = vst.msk [vmem:[#allocation2 + $0x18] sm:$0xff] %vm71_vm0, %v70_v2  ;;  %79 = vadd.xlane.f32.xlu1 %v78_v3  ;;  %73 = vadd.xlane.f32.xlu0 %v72_v4  ;;  %157 = vst.msk [vmem:[#allocation2 + $0x8] sm:$0xff] %vm71_vm0, %v68_v5  ;;  %v81_v6 = vsel %vm71_vm0, %v70_v2, 0.0  ;;  %v75_v7 = vsel %vm71_vm0, %v68_v5, 0.0  ;;  %v160_v40 = vld [vmem:[%s1179_s5] sm:$0xff]  ;;  %v161_v41 = vld [vmem:[%s1179_s5 + $0x8] sm:$0xff] }
  0x29   :  { %v812_v42 = vpack.c.bf16 %v161_v41, %v160_v40  ;;  %v141_v3 = vld [vmem:[%s1175_s1 + $0x8] sm:$0xff]  ;;  %s953_s23 = smov 16   ;;  %vm595_vm1 = vcmask 523264  }
  0x2b   :  { %813 = vmatprep.subr.bf16.mxu1 %v812_v42 }
  0x2c   :  { %82 = vadd.xlane.f32.xlu1 %v81_v6  ;;  %76 = vadd.xlane.f32.xlu0 %v75_v7  ;;  %v142_v6 = vld [vmem:[%s1176_s2] sm:$0xff]  ;;  %v143_v7 = vld [vmem:[%s1176_s2 + $0x8] sm:$0xff] }
  0x2d   :  { %815 = vmatpush3.bf16.msra.mxu1 %v812_v42 }
  0xb5   :  { %v80_v8 = vpop.xlane.xlu1 %79  ;;  %v74_v9 = vpop.xlane.xlu0 %73 }
  0xb9   :  { %v83_v10 = vpop.xlane.xlu1 %82  ;;  %v77_v11 = vpop.xlane.xlu0 %76 }
  0xba   :  { %v91_v12 = vadd.f32 %v83_v10, %v80_v8  ;;  %v84_v13 = vadd.f32 %v77_v11, %v74_v9 }
  0xbc   :  { %v92_v14 = vrot.slane %v91_v12, 4  ;;  %v85_v15 = vrot.slane %v84_v13, 4 }
  0xbe   :  { %v93_v16 = vadd.f32 %v92_v14, %v91_v12  ;;  %v86_v17 = vadd.f32 %v85_v15, %v84_v13 }
  0xc0   :  { %v94_v18 = vrot.slane %v93_v16, 2  ;;  %v87_v19 = vrot.slane %v86_v17, 2 }
  0xc2   :  { %v95_v20 = vadd.f32 %v94_v18, %v93_v16  ;;  %v88_v21 = vadd.f32 %v87_v19, %v86_v17  ;;  %v727_v19 = vld [vmem:[%s1180_s6] ss:$0 sm:$0xff]  ;;  %s954_s6 = smov 96  }
  0xc4   :  { %v96_v22 = vrot.slane %v95_v20, 1  ;;  %v89_v23 = vrot.slane %v88_v21, 1 }
  0xc6   :  { %v97_v24 = vadd.f32 %v96_v22, %v95_v20  ;;  %v90_v25 = vadd.f32 %v89_v23, %v88_v21 }
  0xc8   :  { %v98_v26 = vmul.f32 0.00390625, %v90_v25  ;;  %v99_v27 = vmul.f32 0.00390625, %v97_v24 }
  0xca   :  { %v101_v28 = vsub.f32 %v68_v5, %v98_v26  ;;  %v100_v29 = vsub.f32 %v67_v1, %v98_v26  ;;  %v103_v30 = vsub.f32 %v70_v2, %v99_v27  ;;  %v102_v31 = vsub.f32 %v69_v0, %v99_v27  ;;  %v140_v2 = vld [vmem:[%s1175_s1] sm:$0xff] }
  0xcc   :  { %v105_v32 = vmul.f32 %v101_v28, %v101_v28  ;;  %v104_v33 = vmul.f32 %v100_v29, %v100_v29  ;;  %v107_v36 = vmul.f32 %v103_v30, %v103_v30  ;;  %v106_v37 = vmul.f32 %v102_v31, %v102_v31 }
  0xce   :  { %v111_v34 = vsel %vm71_vm0, %v105_v32, 0.0  ;;  %v108_v35 = vsel %vm71_vm0, %v104_v33, 0.0  ;;  %v117_v38 = vsel %vm71_vm0, %v107_v36, 0.0  ;;  %v114_v39 = vsel %vm71_vm0, %v106_v37, 0.0 }
  0xcf   :  { %112 = vadd.xlane.f32.xlu1 %v111_v34  ;;  %109 = vadd.xlane.f32.xlu0 %v108_v35 }
  0xd3   :  { %118 = vadd.xlane.f32.xlu1 %v117_v38  ;;  %115 = vadd.xlane.f32.xlu0 %v114_v39 }
 0x15c   :  { %v113_v43 = vpop.xlane.xlu1 %112  ;;  %v110_v44 = vpop.xlane.xlu0 %109 }
 0x15d   :  { %v120_v45 = vadd.f32 %v113_v43, %v110_v44 }
 0x15f   :  { %v121_v46 = vrot.slane %v120_v45, 4 }
 0x160   :  { %v119_v47 = vpop.xlane.xlu1 %118  ;;  %v116_v48 = vpop.xlane.xlu0 %115 }
 0x161   :  { %v122_v49 = vadd.f32 %v121_v46, %v120_v45  ;;  %v127_v50 = vadd.f32 %v119_v47, %v116_v48 }
 0x163   :  { %v123_v51 = vrot.slane %v122_v49, 2  ;;  %v128_v52 = vrot.slane %v127_v50, 4 }
 0x165   :  { %v124_v53 = vadd.f32 %v123_v51, %v122_v49  ;;  %v129_v54 = vadd.f32 %v128_v52, %v127_v50 }
 0x167   :  { %v125_v55 = vrot.slane %v124_v53, 1  ;;  %v130_v56 = vrot.slane %v129_v54, 2 }
 0x169   :  { %v126_v57 = vadd.f32 %v125_v55, %v124_v53  ;;  %v131_v58 = vadd.f32 %v130_v56, %v129_v54 }
 0x16b   :  { %v134_v59 = vmul.f32 0.00390625, %v126_v57  ;;  %v132_v60 = vrot.slane %v131_v58, 1 }
 0x16d   :  { %v136_v61 = vadd.f32 1e-05, %v134_v59  ;;  %v133_v62 = vadd.f32 %v132_v60, %v131_v58  ;;  %v291_v60 = vld [vmem:[#allocation2 + $0x8] sm:$0xff] }
 0x16f   :  { %844 = vrsqrt.f32 %v136_v61  ;;  %v135_v63 = vmul.f32 0.00390625, %v133_v62 }
 0x171   :  { %v137_v0 = vadd.f32 1e-05, %v135_v63  ;;  %v290_v63 = vld [vmem:[#allocation2] sm:$0xff] }
 0x173   :  { %846 = vrsqrt.f32 %v137_v0 }
 0x179   :  { %v845_v1 = vpop.eup %844 }
 0x17a   :  { %v144_v4 = vmul.f32 %v845_v1, %v100_v29  ;;  %v145_v5 = vmul.f32 %v845_v1, %v101_v28 }
 0x17c   :  { %v148_v8 = vmul.f32 %v144_v4, %v140_v2  ;;  %v149_v9 = vmul.f32 %v145_v5, %v141_v3  ;;  %v736_v4 = vld [vmem:[%s1184_s10] ss:$0 sm:$0xff] }
 0x17d   :  { %v847_v10 = vpop.eup %846 }
 0x17e   :  { %v146_v11 = vmul.f32 %v847_v10, %v102_v31  ;;  %v152_v12 = vadd.f32 %v148_v8, %v142_v6  ;;  %v153_v13 = vadd.f32 %v149_v9, %v143_v7  ;;  %v147_v14 = vmul.f32 %v847_v10, %v103_v30 }
 0x180   :  { %v150_v15 = vmul.f32 %v146_v11, %v140_v2  ;;  %774 = vmatprep.mubr.msk.f32.mxu1 %vm71_vm0, %v152_v12  ;;  %v151_v16 = vmul.f32 %v147_v14, %v141_v3  ;;  %v292_v2 = vld [vmem:[#allocation2 + $0x10] sm:$0xff] }
 0x181   :  { %775 = vmatmul.mubr.msk.f32.vlgmr.msra.gmra.mrb[0].mxu1 %vm71_vm0, %v153_v13 }
 0x182   :  { %v154_v17 = vadd.f32 %v150_v15, %v142_v6  ;;  %v155_v18 = vadd.f32 %v151_v16, %v143_v7  ;;  %v293_v7 = vld [vmem:[#allocation2 + $0x18] sm:$0xff] }
 0x184   :  { %777 = vmatprep.mubr.msk.f32.mxu1 %vm71_vm0, %v154_v17 }
 0x185   :  { %778 = vmatmul.mubr.msk.f32.gmra.mrb[2].mxu1 %vm71_vm0, %v155_v18 }
 0x254   :  { %v776_v20 = vpop.f32.mrb[0].mxu1 }
 0x255   :  { %v253_v21 = vadd.f32 %v776_v20, %v727_v19  ;;  %v247_v22 = vpop.f32.mrb[1].mxu1 }
 0x256   :  { %v248_v23 = vadd.f32 %v727_v19, %v247_v22 }
 0x257   :  { %300 = vrot.lane.b32.xlu1 %v253_v21, %s952_s18  ;;  %v733_v28 = vmul.f32 -1.442695, %v253_v21 }
 0x258   :  { %298 = vrot.lane.b32.xlu0 %v248_v23, %s952_s18  ;;  %v779_v24 = vpop.f32.mrb[2].mxu1  ;;  %v732_v29 = vmul.f32 -1.442695, %v248_v23 }
 0x259   :  { %v257_v25 = vpop.f32.mrb[3].mxu1  ;;  %v263_v27 = vadd.f32 %v779_v24, %v727_v19  ;;  %848 = vpow2.f32 %v733_v28 }
 0x25a   :  { %v258_v26 = vadd.f32 %v727_v19, %v257_v25  ;;  %850 = vpow2.f32 %v732_v29 }
 0x25b   :  { %316 = vrot.lane.b32.xlu1 %v253_v21, %s953_s23  ;;  %v735_v31 = vmul.f32 -1.442695, %v263_v27 }
 0x25c   :  { %302 = vrot.lane.b32.xlu0 %v258_v26, %s952_s18  ;;  %v734_v30 = vmul.f32 -1.442695, %v258_v26 }
 0x25e   :  { %852 = vpow2.f32 %v734_v30 }
 0x25f   :  { %314 = vrot.lane.b32.xlu1 %v248_v23, %s953_s23  ;;  %854 = vpow2.f32 %v735_v31 }
 0x260   :  { %318 = vrot.lane.b32.xlu0 %v258_v26, %s953_s23 }
 0x263   :  { %304 = vrot.lane.b32.xlu1 %v263_v27, %s952_s18  ;;  %v849_v32 = vpop.eup %848 }
 0x264   :  { %v279_v33 = vadd.f32 1.0, %v849_v32  ;;  %v851_v34 = vpop.eup %850 }
 0x265   :  { %v278_v35 = vadd.f32 1.0, %v851_v34 }
 0x266   :  { %856 = vrcp.f32 %v279_v33 }
 0x267   :  { %320 = vrot.lane.b32.xlu1 %v263_v27, %s953_s23  ;;  %858 = vrcp.f32 %v278_v35 }
 0x268   :  { %v853_v36 = vpop.eup %852 }
 0x269   :  { %v280_v37 = vadd.f32 1.0, %v853_v36  ;;  %v855_v38 = vpop.eup %854 }
 0x26a   :  { %v281_v39 = vadd.f32 1.0, %v855_v38 }
 0x26b   :  { %860 = vrcp.f32 %v280_v37 }
 0x26c   :  { %862 = vrcp.f32 %v281_v39 }
 0x270   :  { %v857_v42 = vpop.eup %856 }
 0x271   :  { %v859_v47 = vpop.eup %858 }
 0x275   :  { %v861_v51 = vpop.eup %860 }
 0x276   :  { %v863_v56 = vpop.eup %862 }
 0x2c9   :  { %v301_v40 = vpop.permute.xlu1 %300 }
 0x2ca   :  { %v299_v41 = vpop.permute.xlu0 %298  ;;  %v311_v43 = vmul.f32 %v857_v42, %v301_v40 }
 0x2cb   :  { %v310_v48 = vmul.f32 %v859_v47, %v299_v41 }
 0x2cd   :  { %v317_v44 = vpop.permute.xlu1 %316 }
 0x2ce   :  { %v327_v45 = vmul.f32 %v317_v44, %v311_v43  ;;  %v303_v46 = vpop.permute.xlu0 %302 }
 0x2cf   :  { %v312_v53 = vmul.f32 %v861_v51, %v303_v46 }
 0x2d0   :  { %336 = vrot.lane.b32.xlu1 %v327_v45, %s954_s6 }
 0x2d1   :  { %v315_v49 = vpop.permute.xlu1 %314 }
 0x2d2   :  { %v326_v50 = vmul.f32 %v315_v49, %v310_v48  ;;  %v319_v52 = vpop.permute.xlu0 %318 }
 0x2d3   :  { %v328_v55 = vmul.f32 %v319_v52, %v312_v53  ;;  %v457_v53 = vld [vmem:[#allocation6] sm:$0xff] }
 0x2d4   :  { %334 = vrot.lane.b32.xlu0 %v326_v50, %s954_s6 }
 0x2d5   :  { %v305_v54 = vpop.permute.xlu1 %304 }
 0x2d6   :  { %v313_v57 = vmul.f32 %v863_v56, %v305_v54  ;;  %v458_v54 = vld [vmem:[#allocation6 + $0x8] sm:$0xff] }
 0x2d8   :  { %338 = vrot.lane.b32.xlu0 %v328_v55, %s954_s6  ;;  %v816_v55 = vpack.c.bf16 %v458_v54, %v457_v53 }
 0x2d9   :  { %v321_v58 = vpop.permute.xlu1 %320 }
 0x2da   :  { %v329_v59 = vmul.f32 %v321_v58, %v313_v57  ;;  %817 = vmatprep.subr.bf16.mxu1 %v816_v55 }
 0x2db   :  { %819 = vmatpush3.bf16.msra.mxu1 %v816_v55 }
 0x2dc   :  { %340 = vrot.lane.b32.xlu1 %v329_v59, %s954_s6 }
 0x342   :  { %v337_v61 = vpop.permute.xlu1 %336 }
 0x343   :  { %v347_v62 = vadd.f32 %v337_v61, %v291_v60 }
 0x345   :  { %351 = vst.msk [vmem:[#allocation2 + $0x8] sm:$0xff] %vm71_vm0, %v347_v62 }
 0x346   :  { %v335_v0 = vpop.permute.xlu0 %334 }
 0x347   :  { %v346_v1 = vadd.f32 %v335_v0, %v290_v63 }
 0x349   :  { %350 = vst.msk [vmem:[#allocation2] sm:$0xff] %vm71_vm0, %v346_v1 }
 0x34a   :  { %v339_v3 = vpop.permute.xlu0 %338 }
 0x34b   :  { %v348_v5 = vadd.f32 %v339_v3, %v292_v2 }
 0x34c   :  { %v355_v6 = vld [vmem:[#allocation2 + $0x8] sm:$0xff] }
 0x34d   :  { %352 = vst.msk [vmem:[#allocation2 + $0x10] sm:$0xff] %vm71_vm0, %v348_v5  ;;  %v361_v8 = vsel %vm71_vm0, %v355_v6, 0.0  ;;  %v450_v9 = vadd.f32 %v736_v4, %v355_v6 }
 0x34e   :  { %362 = vadd.xlane.f32.xlu1 %v361_v8  ;;  %v341_v10 = vpop.permute.xlu1 %340 }
 0x34f   :  { %454 = vst.msk [vmem:[#allocation2 + $0x8] sm:$0xff] %vm71_vm0, %v450_v9  ;;  %v349_v11 = vadd.f32 %v341_v10, %v293_v7 }
 0x350   :  { %v354_v12 = vld [vmem:[#allocation2] sm:$0xff] }
 0x351   :  { %353 = vst.msk [vmem:[#allocation2 + $0x18] sm:$0xff] %vm71_vm0, %v349_v11  ;;  %v358_v13 = vsel %vm71_vm0, %v354_v12, 0.0  ;;  %v449_v14 = vadd.f32 %v736_v4, %v354_v12 }
 0x352   :  { %359 = vadd.xlane.f32.xlu0 %v358_v13 }
 0x353   :  { %453 = vst.msk [vmem:[#allocation2] sm:$0xff] %vm71_vm0, %v449_v14 }
 0x354   :  { %v356_v15 = vld [vmem:[#allocation2 + $0x10] sm:$0xff] }
 0x355   :  { %v364_v16 = vsel %vm71_vm0, %v356_v15, 0.0  ;;  %v451_v17 = vadd.f32 %v736_v4, %v356_v15 }
 0x356   :  { %365 = vadd.xlane.f32.xlu0 %v364_v16  ;;  %v427_v16 = vld [vmem:[%s1177_s3 + $0x8] sm:$0xff] }
 0x357   :  { %455 = vst.msk [vmem:[#allocation2 + $0x10] sm:$0xff] %vm71_vm0, %v451_v17 }
 0x358   :  { %v357_v18 = vld [vmem:[#allocation2 + $0x18] sm:$0xff] }
 0x359   :  { %v367_v19 = vsel %vm71_vm0, %v357_v18, 0.0  ;;  %v452_v20 = vadd.f32 %v736_v4, %v357_v18 }
 0x35a   :  { %368 = vadd.xlane.f32.xlu0 %v367_v19  ;;  %v428_v19 = vld [vmem:[#allocation3] sm:$0xff] }
 0x35b   :  { %456 = vst.msk [vmem:[#allocation2 + $0x18] sm:$0xff] %vm71_vm0, %v452_v20  ;;  %v429_v20 = vld [vmem:[#allocation3 + $0x8] sm:$0xff] }
 0x3db   :  { %v363_v21 = vpop.xlane.xlu1 %362 }
 0x3df   :  { %v360_v22 = vpop.xlane.xlu0 %359 }
 0x3e0   :  { %v370_v23 = vadd.f32 %v363_v21, %v360_v22 }
 0x3e2   :  { %v371_v24 = vrot.slane %v370_v23, 4 }
 0x3e3   :  { %v366_v25 = vpop.xlane.xlu0 %365 }
 0x3e4   :  { %v372_v26 = vadd.f32 %v371_v24, %v370_v23 }
 0x3e6   :  { %v373_v27 = vrot.slane %v372_v26, 2 }
 0x3e7   :  { %v369_v28 = vpop.xlane.xlu0 %368 }
 0x3e8   :  { %v374_v29 = vadd.f32 %v373_v27, %v372_v26  ;;  %v377_v30 = vadd.f32 %v369_v28, %v366_v25 }
 0x3ea   :  { %v375_v31 = vrot.slane %v374_v29, 1  ;;  %v378_v32 = vrot.slane %v377_v30, 4 }
 0x3ec   :  { %v376_v33 = vadd.f32 %v375_v31, %v374_v29  ;;  %v379_v34 = vadd.f32 %v378_v32, %v377_v30  ;;  %v587_v32 = vld [vmem:[%s1183_s9] sm:$0xff] }
 0x3ee   :  { %v380_v35 = vrot.slane %v379_v34, 2  ;;  %v384_v36 = vmul.f32 0.00390625, %v376_v33  ;;  %v588_v33 = vld [vmem:[%s1183_s9 + $0x8] sm:$0xff] }
 0x3f0   :  { %v381_v37 = vadd.f32 %v380_v35, %v379_v34  ;;  %v387_v38 = vsub.f32 %v355_v6, %v384_v36  ;;  %v386_v39 = vsub.f32 %v354_v12, %v384_v36  ;;  %v820_v34 = vpack.c.bf16 %v588_v33, %v587_v32  ;;  %v589_v35 = vld [vmem:[%s1183_s9 + $0x10] sm:$0xff]  ;;  %v590_v36 = vld [vmem:[%s1183_s9 + $0x18] sm:$0xff] }
 0x3f2   :  { %v382_v40 = vrot.slane %v381_v37, 1  ;;  %v391_v41 = vmul.f32 %v387_v38, %v387_v38  ;;  %v390_v42 = vmul.f32 %v386_v39, %v386_v39  ;;  %821 = vmatprep.subr.bf16.mxu0 %v820_v34 }
 0x3f3   :  { %823 = vmatpush3.bf16.msra.mxu0 %v820_v34 }
 0x3f4   :  { %v383_v43 = vadd.f32 %v382_v40, %v381_v37  ;;  %v397_v44 = vsel %vm71_vm0, %v391_v41, 0.0  ;;  %v394_v45 = vsel %vm71_vm0, %v390_v42, 0.0  ;;  %v824_v37 = vpack.c.bf16 %v590_v36, %v589_v35  ;;  %v593_v41 = vld [vmem:[%s1183_s9 + $0x30] sm:$0xff]  ;;  %v594_v42 = vld [vmem:[%s1183_s9 + $0x38] sm:$0xff] }
 0x3f5   :  { %398 = vadd.xlane.f32.xlu1 %v397_v44  ;;  %395 = vadd.xlane.f32.xlu0 %v394_v45  ;;  %v737_v44 = vld [vmem:[%s1182_s8] ss:$0 sm:$0xff]  ;;  %s955_s8 = smov [#allocation8]  }
 0x3f6   :  { %v385_v46 = vmul.f32 0.00390625, %v383_v43  ;;  %825 = vmatprep.subr.bf16.mxu0 %v824_v37  ;;  %v832_v43 = vpack.c.bf16 %v594_v42, %v593_v41 }
 0x3f7   :  { %827 = vmatpush3.bf16.msra.mxu0 %v824_v37 }
 0x3f8   :  { %v389_v47 = vsub.f32 %v357_v18, %v385_v46  ;;  %v388_v48 = vsub.f32 %v356_v15, %v385_v46  ;;  %v426_v15 = vld [vmem:[%s1177_s3] sm:$0xff] }
 0x3fa   :  { %v393_v49 = vmul.f32 %v389_v47, %v389_v47  ;;  %v392_v50 = vmul.f32 %v388_v48, %v388_v48 }
 0x3fc   :  { %v403_v51 = vsel %vm71_vm0, %v393_v49, 0.0  ;;  %v400_v52 = vsel %vm71_vm0, %v392_v50, 0.0 }
 0x3fd   :  { %404 = vadd.xlane.f32.xlu1 %v403_v51  ;;  %401 = vadd.xlane.f32.xlu0 %v400_v52 }
 0x482   :  { %v399_v56 = vpop.xlane.xlu1 %398  ;;  %v396_v57 = vpop.xlane.xlu0 %395 }
 0x483   :  { %v406_v58 = vadd.f32 %v399_v56, %v396_v57 }
 0x485   :  { %v407_v59 = vrot.slane %v406_v58, 4 }
 0x487   :  { %v408_v60 = vadd.f32 %v407_v59, %v406_v58 }
 0x489   :  { %v409_v61 = vrot.slane %v408_v60, 2 }
 0x48a   :  { %v405_v62 = vpop.xlane.xlu1 %404  ;;  %v402_v63 = vpop.xlane.xlu0 %401 }
 0x48b   :  { %v410_v0 = vadd.f32 %v409_v61, %v408_v60  ;;  %v413_v1 = vadd.f32 %v405_v62, %v402_v63 }
 0x48d   :  { %v411_v2 = vrot.slane %v410_v0, 1  ;;  %v414_v3 = vrot.slane %v413_v1, 4 }
 0x48f   :  { %v412_v4 = vadd.f32 %v411_v2, %v410_v0  ;;  %v415_v5 = vadd.f32 %v414_v3, %v413_v1 }
 0x491   :  { %v420_v6 = vmul.f32 0.00390625, %v412_v4  ;;  %v416_v7 = vrot.slane %v415_v5, 2 }
 0x493   :  { %v422_v8 = vadd.f32 1e-05, %v420_v6  ;;  %v417_v9 = vadd.f32 %v416_v7, %v415_v5 }
 0x495   :  { %864 = vrsqrt.f32 %v422_v8  ;;  %v418_v10 = vrot.slane %v417_v9, 1 }
 0x497   :  { %v419_v11 = vadd.f32 %v418_v10, %v417_v9  ;;  %v584_v9 = vld [vmem:[#allocation2 + $0x8] sm:$0xff] }
 0x499   :  { %v421_v12 = vmul.f32 0.00390625, %v419_v11 }
 0x49b   :  { %v423_v13 = vadd.f32 1e-05, %v421_v12  ;;  %v583_v12 = vld [vmem:[#allocation2] sm:$0xff] }
 0x49d   :  { %866 = vrsqrt.f32 %v423_v13 }
 0x49f   :  { %v865_v14 = vpop.eup %864 }
 0x4a0   :  { %v431_v17 = vmul.f32 %v865_v14, %v387_v38  ;;  %v430_v18 = vmul.f32 %v865_v14, %v386_v39  ;;  %v591_v38 = vld [vmem:[%s1183_s9 + $0x20] sm:$0xff]  ;;  %v592_v39 = vld [vmem:[%s1183_s9 + $0x28] sm:$0xff]  ;;  %s714_s9 = sshll.u32 %s955_s8, 4  ;;  %s715_s9 = int_to_ptr.vmem [resolvable:$true] %s714_s9 }
 0x4a1   :  { %v828_v40 = vpack.c.bf16 %v592_v39, %v591_v38  ;;  %s920_s23 = scalar_lea.vmem %s715_s9, 512  ;;  %p925_p3 = scmp.lt.s32.totalorder %s715_s9, %s715_s9 }
 0x4a2   :  { %v434_v21 = vmul.f32 %v430_v18, %v426_v15  ;;  %v435_v22 = vmul.f32 %v431_v17, %v427_v16  ;;  %v585_v18 = vld [vmem:[#allocation2 + $0x10] sm:$0xff]  ;;  %p921_p2 = scmp.ne.s32.totalorder %s715_s9, %s920_s23  ;;  %p926_p4 = scmp.lt.s32.totalorder %s920_s23, %s920_s23 }
 0x4a3   :  { %829 = vmatprep.subr.bf16.mxu0 %v828_v40 }
 0x4a4   :  { %v438_v23 = vadd.f32 %v434_v21, %v428_v19  ;;  %v439_v24 = vadd.f32 %v435_v22, %v429_v20  ;;  %831 = vmatpush3.bf16.msra.mxu0 %v828_v40  ;;  %p927_p5 = por %p926_p4, %p925_p3 }
 0x4a5   :  { %833 = vmatprep.subr.bf16.mxu0 %v832_v43 }
 0x4a6   :  { %784 = vmatprep.mubr.msk.f32.mxu1 %vm71_vm0, %v438_v23  ;;  %p928_p6 = pnand %p927_p5, %p921_p2 }
 0x4a7   :  { %v867_v25 = vpop.eup %866  ;;  %785 = vmatmul.mubr.msk.f32.vlgmr.msra.gmra.mrb[4].mxu1 %vm71_vm0, %v439_v24 }
 0x4a8   :  { %v432_v26 = vmul.f32 %v867_v25, %v388_v48  ;;  %v433_v27 = vmul.f32 %v867_v25, %v389_v47  ;;  %835 = vmatpush3.bf16.msra.mxu0 %v832_v43 }
 0x4aa   :  { %v436_v28 = vmul.f32 %v432_v26, %v426_v15  ;;  %v437_v29 = vmul.f32 %v433_v27, %v427_v16  ;;  %v586_v15 = vld [vmem:[#allocation2 + $0x18] sm:$0xff] }
 0x4ac   :  { %v440_v30 = vadd.f32 %v436_v28, %v428_v19  ;;  %v441_v31 = vadd.f32 %v437_v29, %v429_v20 }
 0x4ae   :  { %787 = vmatprep.mubr.msk.f32.mxu1 %vm71_vm0, %v440_v30 }
 0x4af   :  { %788 = vmatmul.mubr.msk.f32.gmra.mrb[6].mxu1 %vm71_vm0, %v441_v31 }
 0x57a   :  { %v786_v45 = vpop.f32.mrb[4].mxu1 }
 0x57b   :  { %v550_v46 = vadd.f32 %v786_v45, %v737_v44  ;;  %v544_v47 = vpop.f32.mrb[5].mxu1 }
 0x57c   :  { %v545_v48 = vadd.f32 %v737_v44, %v544_v47 }
 0x57d   :  { %v568_v49 = vmul.f32 0.70710677, %v550_v46  ;;  %v564_v62 = vmul.f32 0.5, %v550_v46 }
 0x57e   :  { %v567_v50 = vmul.f32 0.70710677, %v545_v48  ;;  %v563_v60 = vmul.f32 0.5, %v545_v48 }
 0x57f   :  { %868 = verf.f32 %v568_v49 }
 0x580   :  { %870 = verf.f32 %v567_v50 }
 0x582   :  { %v789_v51 = vpop.f32.mrb[6].mxu1 }
 0x583   :  { %v560_v52 = vadd.f32 %v789_v51, %v737_v44  ;;  %v554_v53 = vpop.f32.mrb[7].mxu1 }
 0x584   :  { %v555_v54 = vadd.f32 %v737_v44, %v554_v53 }
 0x585   :  { %v570_v55 = vmul.f32 0.70710677, %v560_v52  ;;  %v566_v6 = vmul.f32 0.5, %v560_v52 }
 0x586   :  { %v569_v56 = vmul.f32 0.70710677, %v555_v54  ;;  %v565_v4 = vmul.f32 0.5, %v555_v54 }
 0x587   :  { %872 = verf.f32 %v570_v55 }
 0x588   :  { %874 = verf.f32 %v569_v56 }
 0x589   :  { %v869_v57 = vpop.eup %868 }
 0x58a   :  { %v871_v58 = vpop.eup %870  ;;  %v576_v59 = vadd.f32 1.0, %v869_v57 }
 0x58b   :  { %v575_v61 = vadd.f32 1.0, %v871_v58 }
 0x58c   :  { %v580_v0 = vmul.f32 %v576_v59, %v564_v62 }
 0x58d   :  { %v579_v63 = vmul.f32 %v575_v61, %v563_v60 }
 0x58f   :  { %806 = vmatprep.mubr.msk.f32.mxu0 %vm595_vm1, %v579_v63 }
 0x590   :  { %807 = vmatmul.mubr.msk.f32.vlgmr.msra.gmra.mrb[0].mxu0 %vm595_vm1, %v580_v0 }
 0x591   :  { %v873_v1 = vpop.eup %872 }
 0x592   :  { %v875_v2 = vpop.eup %874  ;;  %v578_v3 = vadd.f32 1.0, %v873_v1 }
 0x593   :  { %v577_v5 = vadd.f32 1.0, %v875_v2 }
 0x594   :  { %v582_v8 = vmul.f32 %v578_v3, %v566_v6 }
 0x595   :  { %v581_v7 = vmul.f32 %v577_v5, %v565_v4 }
 0x597   :  { %809 = vmatprep.mubr.msk.f32.mxu0 %vm595_vm1, %v581_v7 }
 0x598   :  { %810 = vmatmul.mubr.msk.f32.gmra.mrb[2].mxu0 %vm595_vm1, %v582_v8 }
 0x663   :  { %v808_v10 = vpop.f32.mrb[0].mxu0 }
 0x664   :  { %v694_v11 = vadd.f32 %v808_v10, %v584_v9  ;;  %v674_v13 = vpop.f32.mrb[1].mxu0 }
 0x665   :  { %v693_v14 = vadd.f32 %v674_v13, %v583_v12 }
 0x666   :  { %698 = vst.msk [vmem:[#allocation2 + $0x8] sm:$0xff] %vm71_vm0, %v694_v11 }
 0x667   :  { %697 = vst.msk [vmem:[#allocation2] sm:$0xff] %vm71_vm0, %v693_v14 }
 0x66b   :  { %v811_v16 = vpop.f32.mrb[2].mxu0 }
 0x66c   :  { %v696_v17 = vadd.f32 %v811_v16, %v586_v15  ;;  %v684_v19 = vpop.f32.mrb[3].mxu0 }
 0x66d   :  { %v695_v20 = vadd.f32 %v684_v19, %v585_v18  ;;  %v702_v21 = vld [vmem:[#allocation2 + $0x8] sm:$0xff] }
 0x66e   :  { %700 = vst.msk [vmem:[#allocation2 + $0x18] sm:$0xff] %vm71_vm0, %v696_v17  ;;  %v701_v22 = vld [vmem:[#allocation2] sm:$0xff]  ;;  %706 = vst.msk [vmem:[#allocation8 + $0x8] sm:$0xff] %vm71_vm0, %v702_v21 }
 0x66f   :  { %699 = vst.msk [vmem:[#allocation2 + $0x10] sm:$0xff] %vm71_vm0, %v695_v20  ;;  %705 = vst.msk [vmem:[#allocation8] sm:$0xff] %vm71_vm0, %v701_v22 }
 0x675   :  { %v704_v23 = vld [vmem:[#allocation2 + $0x18] sm:$0xff] }
 0x676   :  { %v703_v24 = vld [vmem:[#allocation2 + $0x10] sm:$0xff]  ;;  %708 = vst.msk [vmem:[#allocation8 + $0x18] sm:$0xff] %vm71_vm0, %v704_v23 }
 0x677   :  { %707 = vst.msk [vmem:[#allocation8 + $0x10] sm:$0xff] %vm71_vm0, %v703_v24 }
 0x678   :  { %931 = shalt.err (!%p928_p6)
}
 0x679   :  { %s932_s25 = scalar_lea.hbm %s1185_s11, 512 }
 0x67a   :  { %p933_p7 = scmp.ne.s32.totalorder %s1185_s11, %s932_s25  ;;  %p936_p8 = scmp.lt.u32.totalorder %s932_s25, %s1185_s11 }
 0x67c   :  { %p938_p9 = pnand %p936_p8, %p933_p7 }
 0x67e   :  { %941 = shalt.err (!%p938_p9)
}
 0x67f   :  { %720 = dma.vmem_to_hbm [thread:$0]  %s715_s9, 512, %s1185_s11, [#allocation5], %s949_s27, %s949_s27, %s950_s28  }
 0x680   :  { %946 = dma.done.wait [#allocation5], 512  }
 0x681   :  { %947 = vsyncadd [#allocation5], 4294966784 }
 0x682   :  { %724 = vsyncpa [#allocation4], 1 }
 0x683   :  { %725 = vsyncpa [#allocation7], 1 }
 0x684   :  { %726 = vsyncpa [#allocation5], 1 }

// kernel: tpu_custom_call.1
= control target key start
LH: loop header
LB: loop body
LE: loop exit
PB: predicated region body
PF: predicated region fallthrough
CT: control target
= control target key end

     0   :  { %16 = vsyncpa [#allocation4], 0  ;;  %s1174_s0 = inlined_call_operand.vmem [shape: f32[2,16,16], index: 0, kind: input, shape index: {}]   ;;  %s1175_s1 = inlined_call_operand.vmem [shape: f32[16,16], index: 1, kind: input, shape index: {}]   ;;  %s1176_s2 = inlined_call_operand.vmem [shape: f32[16,16], index: 2, kind: input, shape index: {}]   ;;  %s1177_s3 = inlined_call_operand.vmem [shape: f32[16,16], index: 3, kind: input, shape index: {}]   ;;  %s1178_s4 = inlined_call_operand.hbm [shape: f32[16,16], index: 4, kind: input, shape index: {}]   ;;  %s1179_s5 = inlined_call_operand.vmem [shape: f32[16,48], index: 5, kind: input, shape index: {}]   ;;  %s1180_s6 = inlined_call_operand.vmem [shape: f32[1,48], index: 6, kind: input, shape index: {}]   ;;  %s1181_s7 = inlined_call_operand.hbm [shape: f32[16,64], index: 7, kind: input, shape index: {}]   ;;  %s1182_s8 = inlined_call_operand.vmem [shape: f32[1,64], index: 8, kind: input, shape index: {}]   ;;  %s1183_s9 = inlined_call_operand.vmem [shape: f32[64,16], index: 9, kind: input, shape index: {}]   ;;  %s1184_s10 = inlined_call_operand.vmem [shape: f32[1,16], index: 10, kind: input, shape index: {}]   ;;  %s1185_s11 = inlined_call_operand.hbm [shape: f32[2,16,16], index: 11, kind: output, shape index: {}]  }
   0x1   :  { %17 = vsyncpa [#allocation7], 0 }
   0x2   :  { %18 = vsyncpa [#allocation5], 0  ;;  %s948_s17 = smov [#allocation3]   ;;  %s876_s21 = scalar_lea.hbm %s1178_s4, 256 }
   0x3   :  { %s32_s18 = sshll.u32 %s948_s17, 4  ;;  %p877_p0 = scmp.ne.s32.totalorder %s1178_s4, %s876_s21  ;;  %s33_s18 = int_to_ptr.vmem [resolvable:$true] %s32_s18 }
   0x4   :  { %p880_p1 = scmp.lt.u32.totalorder %s876_s21, %s1178_s4 }
   0x6   :  { %p882_p2 = pnand %p880_p1, %p877_p0 }
   0x8   :  { %885 = shalt.err (!%p882_p2)
}
   0x9   :  { %s886_s26 = scalar_lea.vmem %s33_s18, 256  ;;  %p891_p4 = scmp.lt.s32.totalorder %s33_s18, %s33_s18 }
   0xa   :  { %p887_p3 = scmp.ne.s32.totalorder %s33_s18, %s886_s26  ;;  %p892_p5 = scmp.lt.s32.totalorder %s886_s26, %s886_s26 }
   0xc   :  { %p893_p6 = por %p892_p5, %p891_p4 }
   0xe   :  { %p894_p7 = pnand %p893_p6, %p887_p3 }
  0x10   :  { %897 = shalt.err (!%p894_p7)
}
  0x11   :  { %s949_s27 = smov 128   ;;  %s950_s28 = smov 8  }
  0x12   :  { %38 = dma.hbm_to_vmem [thread:$0]  %s1178_s4, 256, %s33_s18, [#allocation4], %s949_s27, %s949_s27, %s950_s28  }
  0x13   :  { %s951_s12 = smov [#allocation6]   ;;  %s898_s16 = scalar_lea.hbm %s1181_s7, 256 }
  0x14   :  { %s48_s13 = sshll.u32 %s951_s12, 4  ;;  %p899_p8 = scmp.ne.s32.totalorder %s1181_s7, %s898_s16  ;;  %s49_s13 = int_to_ptr.vmem [resolvable:$true] %s48_s13 }
  0x15   :  { %p902_p9 = scmp.lt.u32.totalorder %s898_s16, %s1181_s7 }
  0x17   :  { %p904_p10 = pnand %p902_p9, %p899_p8 }
  0x19   :  { %907 = shalt.err (!%p904_p10)
}
  0x1a   :  { %s908_s22 = scalar_lea.vmem %s49_s13, 256  ;;  %p913_p12 = scmp.lt.s32.totalorder %s49_s13, %s49_s13 }
  0x1b   :  { %p909_p11 = scmp.ne.s32.totalorder %s49_s13, %s908_s22  ;;  %p914_p13 = scmp.lt.s32.totalorder %s908_s22, %s908_s22 }
  0x1d   :  { %p915_p0 = por %p914_p13, %p913_p12 }
  0x1f   :  { %p916_p1 = pnand %p915_p0, %p909_p11 }
  0x21   :  { %919 = shalt.err (!%p916_p1)
}
  0x22   :  { %54 = dma.hbm_to_vmem [thread:$0]  %s1181_s7, 256, %s49_s13, [#allocation7], %s949_s27, %s949_s27, %s950_s28  }
  0x23   :  { %942 = dma.done.wait [#allocation4], 256  }
  0x24   :  { %943 = vsyncadd [#allocation4], 4294967040 }
  0x25   :  { %944 = dma.done.wait [#allocation7], 256  }
  0x26   :  { %945 = vsyncadd [#allocation7], 4294967040  ;;  %vm71_vm0 = vcmask 130048   ;;  %v69_v0 = vld [vmem:[%s1174_s0 + $0x10] sm:$0xff]  ;;  %v67_v1 = vld [vmem:[%s1174_s0] sm:$0xff]  ;;  %s952_s18 = smov 32  }
  0x27   :  { %v70_v2 = vld [vmem:[%s1174_s0 + $0x18] sm:$0xff]  ;;  %v78_v3 = vsel %vm71_vm0, %v69_v0, 0.0  ;;  %158 = vst.msk [vmem:[#allocation2 + $0x10] sm:$0xff] %vm71_vm0, %v69_v0  ;;  %v72_v4 = vsel %vm71_vm0, %v67_v1, 0.0  ;;  %156 = vst.msk [vmem:[#allocation2] sm:$0xff] %vm71_vm0, %v67_v1  ;;  %v68_v5 = vld [vmem:[%s1174_s0 + $0x8] sm:$0xff] }
  0x28   :  { %159 = vst.msk [vmem:[#allocation2 + $0x18] sm:$0xff] %vm71_vm0, %v70_v2  ;;  %79 = vadd.xlane.f32.xlu1 %v78_v3  ;;  %73 = vadd.xlane.f32.xlu0 %v72_v4  ;;  %157 = vst.msk [vmem:[#allocation2 + $0x8] sm:$0xff] %vm71_vm0, %v68_v5  ;;  %v81_v6 = vsel %vm71_vm0, %v70_v2, 0.0  ;;  %v75_v7 = vsel %vm71_vm0, %v68_v5, 0.0  ;;  %v160_v40 = vld [vmem:[%s1179_s5] sm:$0xff]  ;;  %v161_v41 = vld [vmem:[%s1179_s5 + $0x8] sm:$0xff] }
  0x29   :  { %v812_v42 = vpack.c.bf16 %v161_v41, %v160_v40  ;;  %v141_v3 = vld [vmem:[%s1175_s1 + $0x8] sm:$0xff]  ;;  %s953_s23 = smov 16   ;;  %vm595_vm1 = vcmask 523264  }
  0x2b   :  { %813 = vmatprep.subr.bf16.mxu1 %v812_v42 }
  0x2c   :  { %82 = vadd.xlane.f32.xlu1 %v81_v6  ;;  %76 = vadd.xlane.f32.xlu0 %v75_v7  ;;  %v142_v6 = vld [vmem:[%s1176_s2] sm:$0xff]  ;;  %v143_v7 = vld [vmem:[%s1176_s2 + $0x8] sm:$0xff] }
  0x2d   :  { %815 = vmatpush3.bf16.msra.mxu1 %v812_v42 }
  0xb5   :  { %v80_v8 = vpop.xlane.xlu1 %79  ;;  %v74_v9 = vpop.xlane.xlu0 %73 }
  0xb9   :  { %v83_v10 = vpop.xlane.xlu1 %82  ;;  %v77_v11 = vpop.xlane.xlu0 %76 }
  0xba   :  { %v91_v12 = vadd.f32 %v83_v10, %v80_v8  ;;  %v84_v13 = vadd.f32 %v77_v11, %v74_v9 }
  0xbc   :  { %v92_v14 = vrot.slane %v91_v12, 4  ;;  %v85_v15 = vrot.slane %v84_v13, 4 }
  0xbe   :  { %v93_v16 = vadd.f32 %v92_v14, %v91_v12  ;;  %v86_v17 = vadd.f32 %v85_v15, %v84_v13 }
  0xc0   :  { %v94_v18 = vrot.slane %v93_v16, 2  ;;  %v87_v19 = vrot.slane %v86_v17, 2 }
  0xc2   :  { %v95_v20 = vadd.f32 %v94_v18, %v93_v16  ;;  %v88_v21 = vadd.f32 %v87_v19, %v86_v17  ;;  %v727_v19 = vld [vmem:[%s1180_s6] ss:$0 sm:$0xff]  ;;  %s954_s6 = smov 96  }
  0xc4   :  { %v96_v22 = vrot.slane %v95_v20, 1  ;;  %v89_v23 = vrot.slane %v88_v21, 1 }
  0xc6   :  { %v97_v24 = vadd.f32 %v96_v22, %v95_v20  ;;  %v90_v25 = vadd.f32 %v89_v23, %v88_v21 }
  0xc8   :  { %v98_v26 = vmul.f32 0.00390625, %v90_v25  ;;  %v99_v27 = vmul.f32 0.00390625, %v97_v24 }
  0xca   :  { %v101_v28 = vsub.f32 %v68_v5, %v98_v26  ;;  %v100_v29 = vsub.f32 %v67_v1, %v98_v26  ;;  %v103_v30 = vsub.f32 %v70_v2, %v99_v27  ;;  %v102_v31 = vsub.f32 %v69_v0, %v99_v27  ;;  %v140_v2 = vld [vmem:[%s1175_s1] sm:$0xff] }
  0xcc   :  { %v105_v32 = vmul.f32 %v101_v28, %v101_v28  ;;  %v104_v33 = vmul.f32 %v100_v29, %v100_v29  ;;  %v107_v36 = vmul.f32 %v103_v30, %v103_v30  ;;  %v106_v37 = vmul.f32 %v102_v31, %v102_v31 }
  0xce   :  { %v111_v34 = vsel %vm71_vm0, %v105_v32, 0.0  ;;  %v108_v35 = vsel %vm71_vm0, %v104_v33, 0.0  ;;  %v117_v38 = vsel %vm71_vm0, %v107_v36, 0.0  ;;  %v114_v39 = vsel %vm71_vm0, %v106_v37, 0.0 }
  0xcf   :  { %112 = vadd.xlane.f32.xlu1 %v111_v34  ;;  %109 = vadd.xlane.f32.xlu0 %v108_v35 }
  0xd3   :  { %118 = vadd.xlane.f32.xlu1 %v117_v38  ;;  %115 = vadd.xlane.f32.xlu0 %v114_v39 }
 0x15c   :  { %v113_v43 = vpop.xlane.xlu1 %112  ;;  %v110_v44 = vpop.xlane.xlu0 %109 }
 0x15d   :  { %v120_v45 = vadd.f32 %v113_v43, %v110_v44 }
 0x15f   :  { %v121_v46 = vrot.slane %v120_v45, 4 }
 0x160   :  { %v119_v47 = vpop.xlane.xlu1 %118  ;;  %v116_v48 = vpop.xlane.xlu0 %115 }
 0x161   :  { %v122_v49 = vadd.f32 %v121_v46, %v120_v45  ;;  %v127_v50 = vadd.f32 %v119_v47, %v116_v48 }
 0x163   :  { %v123_v51 = vrot.slane %v122_v49, 2  ;;  %v128_v52 = vrot.slane %v127_v50, 4 }
 0x165   :  { %v124_v53 = vadd.f32 %v123_v51, %v122_v49  ;;  %v129_v54 = vadd.f32 %v128_v52, %v127_v50 }
 0x167   :  { %v125_v55 = vrot.slane %v124_v53, 1  ;;  %v130_v56 = vrot.slane %v129_v54, 2 }
 0x169   :  { %v126_v57 = vadd.f32 %v125_v55, %v124_v53  ;;  %v131_v58 = vadd.f32 %v130_v56, %v129_v54 }
 0x16b   :  { %v134_v59 = vmul.f32 0.00390625, %v126_v57  ;;  %v132_v60 = vrot.slane %v131_v58, 1 }
 0x16d   :  { %v136_v61 = vadd.f32 1e-05, %v134_v59  ;;  %v133_v62 = vadd.f32 %v132_v60, %v131_v58  ;;  %v291_v60 = vld [vmem:[#allocation2 + $0x8] sm:$0xff] }
 0x16f   :  { %844 = vrsqrt.f32 %v136_v61  ;;  %v135_v63 = vmul.f32 0.00390625, %v133_v62 }
 0x171   :  { %v137_v0 = vadd.f32 1e-05, %v135_v63  ;;  %v290_v63 = vld [vmem:[#allocation2] sm:$0xff] }
 0x173   :  { %846 = vrsqrt.f32 %v137_v0 }
 0x179   :  { %v845_v1 = vpop.eup %844 }
 0x17a   :  { %v144_v4 = vmul.f32 %v845_v1, %v100_v29  ;;  %v145_v5 = vmul.f32 %v845_v1, %v101_v28 }
 0x17c   :  { %v148_v8 = vmul.f32 %v144_v4, %v140_v2  ;;  %v149_v9 = vmul.f32 %v145_v5, %v141_v3  ;;  %v736_v4 = vld [vmem:[%s1184_s10] ss:$0 sm:$0xff] }
 0x17d   :  { %v847_v10 = vpop.eup %846 }
 0x17e   :  { %v146_v11 = vmul.f32 %v847_v10, %v102_v31  ;;  %v152_v12 = vadd.f32 %v148_v8, %v142_v6  ;;  %v153_v13 = vadd.f32 %v149_v9, %v143_v7  ;;  %v147_v14 = vmul.f32 %v847_v10, %v103_v30 }
 0x180   :  { %v150_v15 = vmul.f32 %v146_v11, %v140_v2  ;;  %774 = vmatprep.mubr.msk.f32.mxu1 %vm71_vm0, %v152_v12  ;;  %v151_v16 = vmul.f32 %v147_v14, %v141_v3  ;;  %v292_v2 = vld [vmem:[#allocation2 + $0x10] sm:$0xff] }
 0x181   :  { %775 = vmatmul.mubr.msk.f32.vlgmr.msra.gmra.mrb[0].mxu1 %vm71_vm0, %v153_v13 }
 0x182   :  { %v154_v17 = vadd.f32 %v150_v15, %v142_v6  ;;  %v155_v18 = vadd.f32 %v151_v16, %v143_v7  ;;  %v293_v7 = vld [vmem:[#allocation2 + $0x18] sm:$0xff] }
 0x184   :  { %777 = vmatprep.mubr.msk.f32.mxu1 %vm71_vm0, %v154_v17 }
 0x185   :  { %778 = vmatmul.mubr.msk.f32.gmra.mrb[2].mxu1 %vm71_vm0, %v155_v18 }
 0x254   :  { %v776_v20 = vpop.f32.mrb[0].mxu1 }
 0x255   :  { %v253_v21 = vadd.f32 %v776_v20, %v727_v19  ;;  %v247_v22 = vpop.f32.mrb[1].mxu1 }
 0x256   :  { %v248_v23 = vadd.f32 %v727_v19, %v247_v22 }
 0x257   :  { %300 = vrot.lane.b32.xlu1 %v253_v21, %s952_s18  ;;  %v733_v28 = vmul.f32 -1.442695, %v253_v21 }
 0x258   :  { %298 = vrot.lane.b32.xlu0 %v248_v23, %s952_s18  ;;  %v779_v24 = vpop.f32.mrb[2].mxu1  ;;  %v732_v29 = vmul.f32 -1.442695, %v248_v23 }
 0x259   :  { %v257_v25 = vpop.f32.mrb[3].mxu1  ;;  %v263_v27 = vadd.f32 %v779_v24, %v727_v19  ;;  %848 = vpow2.f32 %v733_v28 }
 0x25a   :  { %v258_v26 = vadd.f32 %v727_v19, %v257_v25  ;;  %850 = vpow2.f32 %v732_v29 }
 0x25b   :  { %316 = vrot.lane.b32.xlu1 %v253_v21, %s953_s23  ;;  %v735_v31 = vmul.f32 -1.442695, %v263_v27 }
 0x25c   :  { %302 = vrot.lane.b32.xlu0 %v258_v26, %s952_s18  ;;  %v734_v30 = vmul.f32 -1.442695, %v258_v26 }
 0x25e   :  { %852 = vpow2.f32 %v734_v30 }
 0x25f   :  { %314 = vrot.lane.b32.xlu1 %v248_v23, %s953_s23  ;;  %854 = vpow2.f32 %v735_v31 }
 0x260   :  { %318 = vrot.lane.b32.xlu0 %v258_v26, %s953_s23 }
 0x263   :  { %304 = vrot.lane.b32.xlu1 %v263_v27, %s952_s18  ;;  %v849_v32 = vpop.eup %848 }
 0x264   :  { %v279_v33 = vadd.f32 1.0, %v849_v32  ;;  %v851_v34 = vpop.eup %850 }
 0x265   :  { %v278_v35 = vadd.f32 1.0, %v851_v34 }
 0x266   :  { %856 = vrcp.f32 %v279_v33 }
 0x267   :  { %320 = vrot.lane.b32.xlu1 %v263_v27, %s953_s23  ;;  %858 = vrcp.f32 %v278_v35 }
 0x268   :  { %v853_v36 = vpop.eup %852 }
 0x269   :  { %v280_v37 = vadd.f32 1.0, %v853_v36  ;;  %v855_v38 = vpop.eup %854 }
 0x26a   :  { %v281_v39 = vadd.f32 1.0, %v855_v38 }
 0x26b   :  { %860 = vrcp.f32 %v280_v37 }
 0x26c   :  { %862 = vrcp.f32 %v281_v39 }
 0x270   :  { %v857_v42 = vpop.eup %856 }
 0x271   :  { %v859_v47 = vpop.eup %858 }
 0x275   :  { %v861_v51 = vpop.eup %860 }
 0x276   :  { %v863_v56 = vpop.eup %862 }
 0x2c9   :  { %v301_v40 = vpop.permute.xlu1 %300 }
 0x2ca   :  { %v299_v41 = vpop.permute.xlu0 %298  ;;  %v311_v43 = vmul.f32 %v857_v42, %v301_v40 }
 0x2cb   :  { %v310_v48 = vmul.f32 %v859_v47, %v299_v41 }
 0x2cd   :  { %v317_v44 = vpop.permute.xlu1 %316 }
 0x2ce   :  { %v327_v45 = vmul.f32 %v317_v44, %v311_v43  ;;  %v303_v46 = vpop.permute.xlu0 %302 }
 0x2cf   :  { %v312_v53 = vmul.f32 %v861_v51, %v303_v46 }
 0x2d0   :  { %336 = vrot.lane.b32.xlu1 %v327_v45, %s954_s6 }
 0x2d1   :  { %v315_v49 = vpop.permute.xlu1 %314 }
 0x2d2   :  { %v326_v50 = vmul.f32 %v315_v49, %v310_v48  ;;  %v319_v52 = vpop.permute.xlu0 %318 }
 0x2d3   :  { %v328_v55 = vmul.f32 %v319_v52, %v312_v53  ;;  %v457_v53 = vld [vmem:[#allocation6] sm:$0xff] }
 0x2d4   :  { %334 = vrot.lane.b32.xlu0 %v326_v50, %s954_s6 }
 0x2d5   :  { %v305_v54 = vpop.permute.xlu1 %304 }
 0x2d6   :  { %v313_v57 = vmul.f32 %v863_v56, %v305_v54  ;;  %v458_v54 = vld [vmem:[#allocation6 + $0x8] sm:$0xff] }
 0x2d8   :  { %338 = vrot.lane.b32.xlu0 %v328_v55, %s954_s6  ;;  %v816_v55 = vpack.c.bf16 %v458_v54, %v457_v53 }
 0x2d9   :  { %v321_v58 = vpop.permute.xlu1 %320 }
 0x2da   :  { %v329_v59 = vmul.f32 %v321_v58, %v313_v57  ;;  %817 = vmatprep.subr.bf16.mxu1 %v816_v55 }
 0x2db   :  { %819 = vmatpush3.bf16.msra.mxu1 %v816_v55 }
 0x2dc   :  { %340 = vrot.lane.b32.xlu1 %v329_v59, %s954_s6 }
 0x342   :  { %v337_v61 = vpop.permute.xlu1 %336 }
 0x343   :  { %v347_v62 = vadd.f32 %v337_v61, %v291_v60 }
 0x345   :  { %351 = vst.msk [vmem:[#allocation2 + $0x8] sm:$0xff] %vm71_vm0, %v347_v62 }
 0x346   :  { %v335_v0 = vpop.permute.xlu0 %334 }
 0x347   :  { %v346_v1 = vadd.f32 %v335_v0, %v290_v63 }
 0x349   :  { %350 = vst.msk [vmem:[#allocation2] sm:$0xff] %vm71_vm0, %v346_v1 }
 0x34a   :  { %v339_v3 = vpop.permute.xlu0 %338 }
 0x34b   :  { %v348_v5 = vadd.f32 %v339_v3, %v292_v2 }
 0x34c   :  { %v355_v6 = vld [vmem:[#allocation2 + $0x8] sm:$0xff] }
 0x34d   :  { %352 = vst.msk [vmem:[#allocation2 + $0x10] sm:$0xff] %vm71_vm0, %v348_v5  ;;  %v361_v8 = vsel %vm71_vm0, %v355_v6, 0.0  ;;  %v450_v9 = vadd.f32 %v736_v4, %v355_v6 }
 0x34e   :  { %362 = vadd.xlane.f32.xlu1 %v361_v8  ;;  %v341_v10 = vpop.permute.xlu1 %340 }
 0x34f   :  { %454 = vst.msk [vmem:[#allocation2 + $0x8] sm:$0xff] %vm71_vm0, %v450_v9  ;;  %v349_v11 = vadd.f32 %v341_v10, %v293_v7 }
 0x350   :  { %v354_v12 = vld [vmem:[#allocation2] sm:$0xff] }
 0x351   :  { %353 = vst.msk [vmem:[#allocation2 + $0x18] sm:$0xff] %vm71_vm0, %v349_v11  ;;  %v358_v13 = vsel %vm71_vm0, %v354_v12, 0.0  ;;  %v449_v14 = vadd.f32 %v736_v4, %v354_v12 }
 0x352   :  { %359 = vadd.xlane.f32.xlu0 %v358_v13 }
 0x353   :  { %453 = vst.msk [vmem:[#allocation2] sm:$0xff] %vm71_vm0, %v449_v14 }
 0x354   :  { %v356_v15 = vld [vmem:[#allocation2 + $0x10] sm:$0xff] }
 0x355   :  { %v364_v16 = vsel %vm71_vm0, %v356_v15, 0.0  ;;  %v451_v17 = vadd.f32 %v736_v4, %v356_v15 }
 0x356   :  { %365 = vadd.xlane.f32.xlu0 %v364_v16  ;;  %v427_v16 = vld [vmem:[%s1177_s3 + $0x8] sm:$0xff] }
 0x357   :  { %455 = vst.msk [vmem:[#allocation2 + $0x10] sm:$0xff] %vm71_vm0, %v451_v17 }
 0x358   :  { %v357_v18 = vld [vmem:[#allocation2 + $0x18] sm:$0xff] }
 0x359   :  { %v367_v19 = vsel %vm71_vm0, %v357_v18, 0.0  ;;  %v452_v20 = vadd.f32 %v736_v4, %v357_v18 }
 0x35a   :  { %368 = vadd.xlane.f32.xlu0 %v367_v19  ;;  %v428_v19 = vld [vmem:[#allocation3] sm:$0xff] }
 0x35b   :  { %456 = vst.msk [vmem:[#allocation2 + $0x18] sm:$0xff] %vm71_vm0, %v452_v20  ;;  %v429_v20 = vld [vmem:[#allocation3 + $0x8] sm:$0xff] }
 0x3db   :  { %v363_v21 = vpop.xlane.xlu1 %362 }
 0x3df   :  { %v360_v22 = vpop.xlane.xlu0 %359 }
 0x3e0   :  { %v370_v23 = vadd.f32 %v363_v21, %v360_v22 }
 0x3e2   :  { %v371_v24 = vrot.slane %v370_v23, 4 }
 0x3e3   :  { %v366_v25 = vpop.xlane.xlu0 %365 }
 0x3e4   :  { %v372_v26 = vadd.f32 %v371_v24, %v370_v23 }
 0x3e6   :  { %v373_v27 = vrot.slane %v372_v26, 2 }
 0x3e7   :  { %v369_v28 = vpop.xlane.xlu0 %368 }
 0x3e8   :  { %v374_v29 = vadd.f32 %v373_v27, %v372_v26  ;;  %v377_v30 = vadd.f32 %v369_v28, %v366_v25 }
 0x3ea   :  { %v375_v31 = vrot.slane %v374_v29, 1  ;;  %v378_v32 = vrot.slane %v377_v30, 4 }
 0x3ec   :  { %v376_v33 = vadd.f32 %v375_v31, %v374_v29  ;;  %v379_v34 = vadd.f32 %v378_v32, %v377_v30  ;;  %v587_v32 = vld [vmem:[%s1183_s9] sm:$0xff] }
 0x3ee   :  { %v380_v35 = vrot.slane %v379_v34, 2  ;;  %v384_v36 = vmul.f32 0.00390625, %v376_v33  ;;  %v588_v33 = vld [vmem:[%s1183_s9 + $0x8] sm:$0xff] }
 0x3f0   :  { %v381_v37 = vadd.f32 %v380_v35, %v379_v34  ;;  %v387_v38 = vsub.f32 %v355_v6, %v384_v36  ;;  %v386_v39 = vsub.f32 %v354_v12, %v384_v36  ;;  %v820_v34 = vpack.c.bf16 %v588_v33, %v587_v32  ;;  %v589_v35 = vld [vmem:[%s1183_s9 + $0x10] sm:$0xff]  ;;  %v590_v36 = vld [vmem:[%s1183_s9 + $0x18] sm:$0xff] }
 0x3f2   :  { %v382_v40 = vrot.slane %v381_v37, 1  ;;  %v391_v41 = vmul.f32 %v387_v38, %v387_v38  ;;  %v390_v42 = vmul.f32 %v386_v39, %v386_v39  ;;  %821 = vmatprep.subr.bf16.mxu0 %v820_v34 }
 0x3f3   :  { %823 = vmatpush3.bf16.msra.mxu0 %v820_v34 }
 0x3f4   :  { %v383_v43 = vadd.f32 %v382_v40, %v381_v37  ;;  %v397_v44 = vsel %vm71_vm0, %v391_v41, 0.0  ;;  %v394_v45 = vsel %vm71_vm0, %v390_v42, 0.0  ;;  %v824_v37 = vpack.c.bf16 %v590_v36, %v589_v35  ;;  %v593_v41 = vld [vmem:[%s1183_s9 + $0x30] sm:$0xff]  ;;  %v594_v42 = vld [vmem:[%s1183_s9 + $0x38] sm:$0xff] }
 0x3f5   :  { %398 = vadd.xlane.f32.xlu1 %v397_v44  ;;  %395 = vadd.xlane.f32.xlu0 %v394_v45  ;;  %v737_v44 = vld [vmem:[%s1182_s8] ss:$0 sm:$0xff]  ;;  %s955_s8 = smov [#allocation8]  }
 0x3f6   :  { %v385_v46 = vmul.f32 0.00390625, %v383_v43  ;;  %825 = vmatprep.subr.bf16.mxu0 %v824_v37  ;;  %v832_v43 = vpack.c.bf16 %v594_v42, %v593_v41 }
 0x3f7   :  { %827 = vmatpush3.bf16.msra.mxu0 %v824_v37 }
 0x3f8   :  { %v389_v47 = vsub.f32 %v357_v18, %v385_v46  ;;  %v388_v48 = vsub.f32 %v356_v15, %v385_v46  ;;  %v426_v15 = vld [vmem:[%s1177_s3] sm:$0xff] }
 0x3fa   :  { %v393_v49 = vmul.f32 %v389_v47, %v389_v47  ;;  %v392_v50 = vmul.f32 %v388_v48, %v388_v48 }
 0x3fc   :  { %v403_v51 = vsel %vm71_vm0, %v393_v49, 0.0  ;;  %v400_v52 = vsel %vm71_vm0, %v392_v50, 0.0 }
 0x3fd   :  { %404 = vadd.xlane.f32.xlu1 %v403_v51  ;;  %401 = vadd.xlane.f32.xlu0 %v400_v52 }
 0x482   :  { %v399_v56 = vpop.xlane.xlu1 %398  ;;  %v396_v57 = vpop.xlane.xlu0 %395 }
 0x483   :  { %v406_v58 = vadd.f32 %v399_v56, %v396_v57 }
 0x485   :  { %v407_v59 = vrot.slane %v406_v58, 4 }
 0x487   :  { %v408_v60 = vadd.f32 %v407_v59, %v406_v58 }
 0x489   :  { %v409_v61 = vrot.slane %v408_v60, 2 }
 0x48a   :  { %v405_v62 = vpop.xlane.xlu1 %404  ;;  %v402_v63 = vpop.xlane.xlu0 %401 }
 0x48b   :  { %v410_v0 = vadd.f32 %v409_v61, %v408_v60  ;;  %v413_v1 = vadd.f32 %v405_v62, %v402_v63 }
 0x48d   :  { %v411_v2 = vrot.slane %v410_v0, 1  ;;  %v414_v3 = vrot.slane %v413_v1, 4 }
 0x48f   :  { %v412_v4 = vadd.f32 %v411_v2, %v410_v0  ;;  %v415_v5 = vadd.f32 %v414_v3, %v413_v1 }
 0x491   :  { %v420_v6 = vmul.f32 0.00390625, %v412_v4  ;;  %v416_v7 = vrot.slane %v415_v5, 2 }
 0x493   :  { %v422_v8 = vadd.f32 1e-05, %v420_v6  ;;  %v417_v9 = vadd.f32 %v416_v7, %v415_v5 }
 0x495   :  { %864 = vrsqrt.f32 %v422_v8  ;;  %v418_v10 = vrot.slane %v417_v9, 1 }
 0x497   :  { %v419_v11 = vadd.f32 %v418_v10, %v417_v9  ;;  %v584_v9 = vld [vmem:[#allocation2 + $0x8] sm:$0xff] }
 0x499   :  { %v421_v12 = vmul.f32 0.00390625, %v419_v11 }
 0x49b   :  { %v423_v13 = vadd.f32 1e-05, %v421_v12  ;;  %v583_v12 = vld [vmem:[#allocation2] sm:$0xff] }
 0x49d   :  { %866 = vrsqrt.f32 %v423_v13 }
 0x49f   :  { %v865_v14 = vpop.eup %864 }
 0x4a0   :  { %v431_v17 = vmul.f32 %v865_v14, %v387_v38  ;;  %v430_v18 = vmul.f32 %v865_v14, %v386_v39  ;;  %v591_v38 = vld [vmem:[%s1183_s9 + $0x20] sm:$0xff]  ;;  %v592_v39 = vld [vmem:[%s1183_s9 + $0x28] sm:$0xff]  ;;  %s714_s9 = sshll.u32 %s955_s8, 4  ;;  %s715_s9 = int_to_ptr.vmem [resolvable:$true] %s714_s9 }
 0x4a1   :  { %v828_v40 = vpack.c.bf16 %v592_v39, %v591_v38  ;;  %s920_s23 = scalar_lea.vmem %s715_s9, 512  ;;  %p925_p3 = scmp.lt.s32.totalorder %s715_s9, %s715_s9 }
 0x4a2   :  { %v434_v21 = vmul.f32 %v430_v18, %v426_v15  ;;  %v435_v22 = vmul.f32 %v431_v17, %v427_v16  ;;  %v585_v18 = vld [vmem:[#allocation2 + $0x10] sm:$0xff]  ;;  %p921_p2 = scmp.ne.s32.totalorder %s715_s9, %s920_s23  ;;  %p926_p4 = scmp.lt.s32.totalorder %s920_s23, %s920_s23 }
 0x4a3   :  { %829 = vmatprep.subr.bf16.mxu0 %v828_v40 }
 0x4a4   :  { %v438_v23 = vadd.f32 %v434_v21, %v428_v19  ;;  %v439_v24 = vadd.f32 %v435_v22, %v429_v20  ;;  %831 = vmatpush3.bf16.msra.mxu0 %v828_v40  ;;  %p927_p5 = por %p926_p4, %p925_p3 }
 0x4a5   :  { %833 = vmatprep.subr.bf16.mxu0 %v832_v43 }
 0x4a6   :  { %784 = vmatprep.mubr.msk.f32.mxu1 %vm71_vm0, %v438_v23  ;;  %p928_p6 = pnand %p927_p5, %p921_p2 }
 0x4a7   :  { %v867_v25 = vpop.eup %866  ;;  %785 = vmatmul.mubr.msk.f32.vlgmr.msra.gmra.mrb[4].mxu1 %vm71_vm0, %v439_v24 }
 0x4a8   :  { %v432_v26 = vmul.f32 %v867_v25, %v388_v48  ;;  %v433_v27 = vmul.f32 %v867_v25, %v389_v47  ;;  %835 = vmatpush3.bf16.msra.mxu0 %v832_v43 }
 0x4aa   :  { %v436_v28 = vmul.f32 %v432_v26, %v426_v15  ;;  %v437_v29 = vmul.f32 %v433_v27, %v427_v16  ;;  %v586_v15 = vld [vmem:[#allocation2 + $0x18] sm:$0xff] }
 0x4ac   :  { %v440_v30 = vadd.f32 %v436_v28, %v428_v19  ;;  %v441_v31 = vadd.f32 %v437_v29, %v429_v20 }
 0x4ae   :  { %787 = vmatprep.mubr.msk.f32.mxu1 %vm71_vm0, %v440_v30 }
 0x4af   :  { %788 = vmatmul.mubr.msk.f32.gmra.mrb[6].mxu1 %vm71_vm0, %v441_v31 }
 0x57a   :  { %v786_v45 = vpop.f32.mrb[4].mxu1 }
 0x57b   :  { %v550_v46 = vadd.f32 %v786_v45, %v737_v44  ;;  %v544_v47 = vpop.f32.mrb[5].mxu1 }
 0x57c   :  { %v545_v48 = vadd.f32 %v737_v44, %v544_v47 }
 0x57d   :  { %v568_v49 = vmul.f32 0.70710677, %v550_v46  ;;  %v564_v62 = vmul.f32 0.5, %v550_v46 }
 0x57e   :  { %v567_v50 = vmul.f32 0.70710677, %v545_v48  ;;  %v563_v60 = vmul.f32 0.5, %v545_v48 }
 0x57f   :  { %868 = verf.f32 %v568_v49 }
 0x580   :  { %870 = verf.f32 %v567_v50 }
 0x582   :  { %v789_v51 = vpop.f32.mrb[6].mxu1 }
 0x583   :  { %v560_v52 = vadd.f32 %v789_v51, %v737_v44  ;;  %v554_v53 = vpop.f32.mrb[7].mxu1 }
 0x584   :  { %v555_v54 = vadd.f32 %v737_v44, %v554_v53 }
 0x585   :  { %v570_v55 = vmul.f32 0.70710677, %v560_v52  ;;  %v566_v6 = vmul.f32 0.5, %v560_v52 }
 0x586   :  { %v569_v56 = vmul.f32 0.70710677, %v555_v54  ;;  %v565_v4 = vmul.f32 0.5, %v555_v54 }
 0x587   :  { %872 = verf.f32 %v570_v55 }
 0x588   :  { %874 = verf.f32 %v569_v56 }
 0x589   :  { %v869_v57 = vpop.eup %868 }
 0x58a   :  { %v871_v58 = vpop.eup %870  ;;  %v576_v59 = vadd.f32 1.0, %v869_v57 }
 0x58b   :  { %v575_v61 = vadd.f32 1.0, %v871_v58 }
 0x58c   :  { %v580_v0 = vmul.f32 %v576_v59, %v564_v62 }
 0x58d   :  { %v579_v63 = vmul.f32 %v575_v61, %v563_v60 }
 0x58f   :  { %806 = vmatprep.mubr.msk.f32.mxu0 %vm595_vm1, %v579_v63 }
 0x590   :  { %807 = vmatmul.mubr.msk.f32.vlgmr.msra.gmra.mrb[0].mxu0 %vm595_vm1, %v580_v0 }
 0x591   :  { %v873_v1 = vpop.eup %872 }
 0x592   :  { %v875_v2 = vpop.eup %874  ;;  %v578_v3 = vadd.f32 1.0, %v873_v1 }
 0x593   :  { %v577_v5 = vadd.f32 1.0, %v875_v2 }
 0x594   :  { %v582_v8 = vmul.f32 %v578_v3, %v566_v6 }
 0x595   :  { %v581_v7 = vmul.f32 %v577_v5, %v565_v4 }
 0x597   :  { %809 = vmatprep.mubr.msk.f32.mxu0 %vm595_vm1, %v581_v7 }
 0x598   :  { %810 = vmatmul.mubr.msk.f32.gmra.mrb[2].mxu0 %vm595_vm1, %v582_v8 }
 0x663   :  { %v808_v10 = vpop.f32.mrb[0].mxu0 }
 0x664   :  { %v694_v11 = vadd.f32 %v808_v10, %v584_v9  ;;  %v674_v13 = vpop.f32.mrb[1].mxu0 }
 0x665   :  { %v693_v14 = vadd.f32 %v674_v13, %v583_v12 }
 0x666   :  { %698 = vst.msk [vmem:[#allocation2 + $0x8] sm:$0xff] %vm71_vm0, %v694_v11 }
 0x667   :  { %697 = vst.msk [vmem:[#allocation2] sm:$0xff] %vm71_vm0, %v693_v14 }
 0x66b   :  { %v811_v16 = vpop.f32.mrb[2].mxu0 }
 0x66c   :  { %v696_v17 = vadd.f32 %v811_v16, %v586_v15  ;;  %v684_v19 = vpop.f32.mrb[3].mxu0 }
 0x66d   :  { %v695_v20 = vadd.f32 %v684_v19, %v585_v18  ;;  %v702_v21 = vld [vmem:[#allocation2 + $0x8] sm:$0xff] }
 0x66e   :  { %700 = vst.msk [vmem:[#allocation2 + $0x18] sm:$0xff] %vm71_vm0, %v696_v17  ;;  %v701_v22 = vld [vmem:[#allocation2] sm:$0xff]  ;;  %706 = vst.msk [vmem:[#allocation8 + $0x8] sm:$0xff] %vm71_vm0, %v702_v21 }
 0x66f   :  { %699 = vst.msk [vmem:[#allocation2 + $0x10] sm:$0xff] %vm71_vm0, %v695_v20  ;;  %705 = vst.msk [vmem:[#allocation8] sm:$0xff] %vm71_vm0, %v701_v22 }
 0x675   :  { %v704_v23 = vld [vmem:[#allocation2 + $0x18] sm:$0xff] }
 0x676   :  { %v703_v24 = vld [vmem:[#allocation2 + $0x10] sm:$0xff]  ;;  %708 = vst.msk [vmem:[#allocation8 + $0x18] sm:$0xff] %vm71_vm0, %v704_v23 }
 0x677   :  { %707 = vst.msk [vmem:[#allocation8 + $0x10] sm:$0xff] %vm71_vm0, %v703_v24 }
 0x678   :  { %931 = shalt.err (!%p928_p6)
}
 0x679   :  { %s932_s25 = scalar_lea.hbm %s1185_s11, 512 }
 0x67a   :  { %p933_p7 = scmp.ne.s32.totalorder %s1185_s11, %s932_s25  ;;  %p936_p8 = scmp.lt.u32.totalorder %s932_s25, %s1185_s11 }
 0x67c   :  { %p938_p9 = pnand %p936_p8, %p933_p7 }
 0x67e   :  { %941 = shalt.err (!%p938_p9)
}
 0x67f   :  { %720 = dma.vmem_to_hbm [thread:$0]  %s715_s9, 512, %s1185_s11, [#allocation5], %s949_s27, %s949_s27, %s950_s28  }
 0x680   :  { %946 = dma.done.wait [#allocation5], 512  }
 0x681   :  { %947 = vsyncadd [#allocation5], 4294966784 }
 0x682   :  { %724 = vsyncpa [#allocation4], 1 }
 0x683   :  { %725 = vsyncpa [#allocation7], 1 }
 0x684   :  { %726 = vsyncpa [#allocation5], 1 }

</bundles_post_ra>
